<compile_context>
chip_gen: v6e
topology: v6e:2x2x1
jax: 0.10.0
libtpu: 0.0.40
codegen_flags: <defaults>
</compile_context>

<pallas_src>
import numpy as np
import jax
import jax.numpy as jnp
from jax import lax
from jax.experimental import pallas as pl
from jax.experimental.pallas import tpu as pltpu


# ---------------- network constants ----------------
IN_HW = 32          # input spatial size (LeNet: 32x32, 1 channel)
KSIZE = 5
C1, C2 = 6, 16
CONV1_HW = IN_HW - KSIZE + 1          # 28
POOL1_HW = CONV1_HW // 2              # 14
CONV2_HW = POOL1_HW - KSIZE + 1       # 10
POOL2_HW = CONV2_HW // 2              # 5
F1, F2, F3 = 120, 84, 10


# ---------------- in-kernel helpers (traced inside the Pallas kernel) ----------------

def _conv_rows(x, m_ref, bias_row, kh, ho):
    # x: (H, Win*Cin); m_ref[di]: (Win*Cin, Wo*Cout) block-Toeplitz row matrix
    acc = jnp.dot(x[0:ho, :], m_ref[0], preferred_element_type=jnp.float32)
    for di in range(1, kh):
        acc = acc + jnp.dot(x[di:di + ho, :], m_ref[di],
                            preferred_element_type=jnp.float32)
    return acc + bias_row                                     # (Ho, Wo*Cout)


# ---------------- the fused kernel ----------------

def mynet_kernel(x_ref, m1_ref, b1_ref, m2_ref, b2_ref, r1_ref, s1_ref,
                 wfc_ref, bfc_ref, o_ref):
    img = x_ref[0]                                            # (32, 32)

    # conv1: (28, 168)
    c1 = _conv_rows(img, m1_ref, b1_ref[...], KSIZE, CONV1_HW)

    # pool1 (2x2 max): shifted maxes + row/col selection matmuls -> (14, 84)
    zw1 = jnp.maximum(c1[:, :-C1], c1[:, C1:])                # (28, 162)
    zh1 = jnp.maximum(zw1[:-1, :], zw1[1:, :])                # (27, 162)
    t1 = jnp.dot(r1_ref[...], zh1, preferred_element_type=jnp.float32)  # (14, 162)
    p1 = jnp.dot(t1, s1_ref[...], preferred_element_type=jnp.float32)   # (14, 84)

    # conv2: (10, 160)
    c2 = _conv_rows(p1, m2_ref, b2_ref[...], KSIZE, CONV2_HW)

    # pool2 + fc1 + fc2 + fc3 (fused).  Width/height maxes, then one matmul
    # against the fused FC weight; pool-2's 2x down-sampling is baked into the
    # weight packing (columns) and into the static slices below (rows).
    zw2 = jnp.maximum(c2[:, :-C2], c2[:, C2:])                # (10, 144)
    zh2 = jnp.maximum(zw2[:-1, :], zw2[1:, :])                # (9, 144)
    g = jnp.dot(zh2, wfc_ref[...], preferred_element_type=jnp.float32)   # (9, 50)

    h = bfc_ref[...]                                          # (1, 10)
    for r in range(POOL2_HW):
        h = h + g[2 * r:2 * r + 1, F3 * r:F3 * (r + 1)]
    o_ref[...] = h.reshape(1, 1, F3)


# ---------------- wrapper ----------------

def _resident_spec(shape):
    zeros = (0,) * len(shape)
    return pl.BlockSpec(shape, lambda i, _z=zeros: _z)


def mynet_forward(x_nchw, packed):
    B = x_nchw.shape[0]
    x = x_nchw.reshape(B, IN_HW, IN_HW).astype(jnp.float32)   # drop Cin=1 dim

    in_specs = [pl.BlockSpec((1, IN_HW, IN_HW), lambda i: (i, 0, 0))]
    in_specs += [_resident_spec(w.shape) for w in packed]

    out = pl.pallas_call(
        mynet_kernel,
        out_shape=jax.ShapeDtypeStruct((B, 1, F3), jnp.float32),
        grid=(B,),
        in_specs=in_specs,
        out_specs=pl.BlockSpec((1, 1, F3), lambda i: (i, 0, 0)),
        compiler_params=pltpu.CompilerParams(
            dimension_semantics=("parallel",)),
    )(x, *packed)
    return out.reshape(B, F3)


# ---------------- one-time host-side weight packing ----------------

def _pack_conv(wt, win):
    """wt: (Cout, Cin, kh, kw) -> (kh, win*Cin, (win-kw+1)*Cout) Toeplitz rows."""
    wt = np.asarray(wt, np.float32)
    cout, cin, kh, kw = wt.shape
    wo = win - kw + 1
    m = np.zeros((kh, win * cin, wo * cout), np.float32)
    for di in range(kh):
        for w in range(wo):
            for dj in range(kw):
                m[di, (w + dj) * cin:(w + dj + 1) * cin,
                  w * cout:(w + 1) * cout] = wt[:, :, di, dj].T
    return m


def _pool_selectors(ho, wo, c):
    r = np.zeros((ho, 2 * ho - 1), np.float32)
    r[np.arange(ho), 2 * np.arange(ho)] = 1.0
    s = np.zeros(((2 * wo - 1) * c, wo * c), np.float32)
    for j in range(wo):
        s[2 * j * c:2 * j * c + c, j * c:(j + 1) * c] = np.eye(c, dtype=np.float32)
    return r, s


def _fuse_tail(p):
    """Fuse fc1->fc2->fc3 (no activations between them) into one 400->10 map,
    re-order its 400 inputs from PyTorch NCHW flatten to the kernel's
    (row h, lane w*C2+c) slab layout, and fold MaxPool-2's column selection."""
    w1 = np.asarray(p["fc1_w"], np.float32)      # (120, 400)
    b1 = np.asarray(p["fc1_b"], np.float32)
    w2 = np.asarray(p["fc2_w"], np.float32)      # (84, 120)
    b2 = np.asarray(p["fc2_b"], np.float32)
    w3 = np.asarray(p["fc3_w"], np.float32)      # (10, 84)
    b3 = np.asarray(p["fc3_b"], np.float32)

    wc = w1.T @ w2.T @ w3.T                      # (400, 10): y = flat @ wc + bc
    bc = b1 @ w2.T @ w3.T + b2 @ w3.T + b3       # (10,)

    # PyTorch flat index = c*25 + h*5 + w  ->  (h, w*C2 + c, out)
    wperm = (wc.T.reshape(F3, C2, POOL2_HW, POOL2_HW)
               .transpose(2, 3, 1, 0)
               .reshape(POOL2_HW, POOL2_HW * C2, F3))          # (5, 80, 10)

    # fold pool-2 width selection: pooled lane (w, c) reads width-maxed lane 2w*C2+c
    _, s2 = _pool_selectors(POOL2_HW, POOL2_HW, C2)            # (144, 80)
    wfc = np.concatenate([s2 @ wperm[h] for h in range(POOL2_HW)],
                         axis=1)                               # (144, 50)
    return jnp.asarray(wfc), jnp.asarray(bc[None, :])


def pack_params(p):
    m1 = jnp.asarray(_pack_conv(p["conv1_w"], IN_HW))                 # (5, 32, 168)
    b1 = jnp.asarray(np.tile(np.asarray(p["conv1_b"], np.float32), CONV1_HW)[None, :])
    m2 = jnp.asarray(_pack_conv(p["conv2_w"], POOL1_HW))              # (5, 84, 160)
    b2 = jnp.asarray(np.tile(np.asarray(p["conv2_b"], np.float32), CONV2_HW)[None, :])
    r1, s1 = _pool_selectors(POOL1_HW, POOL1_HW, C1)                  # (14,27), (162,84)
    wfc, bfc = _fuse_tail(p)                                          # (144, 50), (1, 10)
    return (m1, b1, m2, b2, jnp.asarray(r1), jnp.asarray(s1), wfc, bfc)


# ---------------- canonical (PyTorch-layout) params ----------------

def init_canonical_params(key):
    ks = jax.random.split(key, 10)

    def u(k, shape, fan_in):
        b = float(1.0 / np.sqrt(fan_in))
        return jax.random.uniform(k, shape, jnp.float32, -b, b)

    return {
        "conv1_w": u(ks[0], (C1, 1, KSIZE, KSIZE), 1 * KSIZE * KSIZE),
        "conv1_b": u(ks[1], (C1,), 1 * KSIZE * KSIZE),
        "conv2_w": u(ks[2], (C2, C1, KSIZE, KSIZE), C1 * KSIZE * KSIZE),
        "conv2_b": u(ks[3], (C2,), C1 * KSIZE * KSIZE),
        "fc1_w": u(ks[4], (F1, C2 * POOL2_HW * POOL2_HW), 400),
        "fc1_b": u(ks[5], (F1,), 400),
        "fc2_w": u(ks[6], (F2, F1), F1),
        "fc2_b": u(ks[7], (F2,), F1),
        "fc3_w": u(ks[8], (F3, F2), F2),
        "fc3_b": u(ks[9], (F3,), F2),
    }


# ---------------- pure-JAX reference (PyTorch semantics) ----------------

def reference_forward(x_nchw, p):
    dn = ("NCHW", "OIHW", "NCHW")
    y = lax.conv_general_dilated(x_nchw, p["conv1_w"], (1, 1), "VALID",
                                 dimension_numbers=dn) + p["conv1_b"][None, :, None, None]
    y = lax.reduce_window(y, -jnp.inf, lax.max, (1, 1, 2, 2), (1, 1, 2, 2), "VALID")
    y = lax.conv_general_dilated(y, p["conv2_w"], (1, 1), "VALID",
                                 dimension_numbers=dn) + p["conv2_b"][None, :, None, None]
    y = lax.reduce_window(y, -jnp.inf, lax.max, (1, 1, 2, 2), (1, 1, 2, 2), "VALID")
    y = y.reshape(y.shape[0], -1)                      # PyTorch NCHW flatten
    y = y @ p["fc1_w"].T + p["fc1_b"]
    y = y @ p["fc2_w"].T + p["fc2_b"]
    y = y @ p["fc3_w"].T + p["fc3_b"]
    return y


if __name__ == "__main__":
    key = jax.random.PRNGKey(0)
    k_param, k_data = jax.random.split(key)

    params = init_canonical_params(k_param)
    packed = pack_params(params)
    x = jax.random.normal(k_data, (2, 1, IN_HW, IN_HW), jnp.float32)  # NCHW like PyTorch

    fwd = jax.jit(mynet_forward)
    out = fwd(x, packed)
    jax.block_until_ready(out)
    assert out.shape == (2, F3) and out.dtype == jnp.float32

    ref = reference_forward(x, params)
    assert bool(jnp.allclose(out, ref, rtol=1e-2, atol=1e-2)), (
        "mismatch vs reference, max abs err = %e"
        % float(jnp.max(jnp.abs(out - ref))))

    print("KERNEL_OK")
</pallas_src>

<mosaic_0001>
module attributes {stable_mosaic.version = 11 : i64} {
  func.func @mynet_kernel(%arg0: i32, %arg1: memref<1x32x32xf32, #tpu.memory_space<vmem>>, %arg2: memref<5x32x168xf32, #tpu.memory_space<vmem>>, %arg3: memref<1x168xf32, #tpu.memory_space<vmem>>, %arg4: memref<5x84x160xf32, #tpu.memory_space<vmem>>, %arg5: memref<1x160xf32, #tpu.memory_space<vmem>>, %arg6: memref<14x27xf32, #tpu.memory_space<vmem>>, %arg7: memref<162x84xf32, #tpu.memory_space<vmem>>, %arg8: memref<144x50xf32, #tpu.memory_space<vmem>>, %arg9: memref<1x10xf32, #tpu.memory_space<vmem>>, %arg10: memref<1x1x10xf32, #tpu.memory_space<vmem>>) attributes {dimension_semantics = [#tpu.dimension_semantics<parallel>], iteration_bounds = array<i64: 2>, scalar_prefetch = 0 : i64, scratch_operands = 0 : i64, tpu.core_type = #tpu.core_type<tc>, window_params = [{transform_indices = @transform_0, window_bounds = array<i64: 1, 32, 32>}, {pipeline_mode = #tpu.pipeline_mode<synchronous>, transform_indices = @transform_1, window_bounds = array<i64: 5, 32, 168>}, {pipeline_mode = #tpu.pipeline_mode<synchronous>, transform_indices = @transform_2, window_bounds = array<i64: 1, 168>}, {pipeline_mode = #tpu.pipeline_mode<synchronous>, transform_indices = @transform_3, window_bounds = array<i64: 5, 84, 160>}, {pipeline_mode = #tpu.pipeline_mode<synchronous>, transform_indices = @transform_4, window_bounds = array<i64: 1, 160>}, {pipeline_mode = #tpu.pipeline_mode<synchronous>, transform_indices = @transform_5, window_bounds = array<i64: 14, 27>}, {pipeline_mode = #tpu.pipeline_mode<synchronous>, transform_indices = @transform_6, window_bounds = array<i64: 162, 84>}, {pipeline_mode = #tpu.pipeline_mode<synchronous>, transform_indices = @transform_7, window_bounds = array<i64: 144, 50>}, {pipeline_mode = #tpu.pipeline_mode<synchronous>, transform_indices = @transform_8, window_bounds = array<i64: 1, 10>}, {transform_indices = @transform_9, window_bounds = array<i64: 1, 1, 10>}]} {
    %c0 = arith.constant 0 : index
    %c0_0 = arith.constant 0 : index
    %c0_1 = arith.constant 0 : index
    %0 = vector.load %arg1[%c0, %c0_0, %c0_1] : memref<1x32x32xf32, #tpu.memory_space<vmem>>, vector<1x32x32xf32>
    %1 = vector.shape_cast %0 : vector<1x32x32xf32> to vector<32x32xf32>
    %c0_2 = arith.constant 0 : index
    %c0_3 = arith.constant 0 : index
    %2 = vector.load %arg3[%c0_2, %c0_3] : memref<1x168xf32, #tpu.memory_space<vmem>>, vector<1x168xf32>
    %3 = vector.extract_strided_slice %1 {offsets = [0, 0], sizes = [28, 32], strides = [1, 1]} : vector<32x32xf32> to vector<28x32xf32>
    %c0_4 = arith.constant 0 : index
    %c0_5 = arith.constant 0 : index
    %c0_6 = arith.constant 0 : index
    %4 = vector.load %arg2[%c0_4, %c0_5, %c0_6] : memref<5x32x168xf32, #tpu.memory_space<vmem>>, vector<1x32x168xf32>
    %5 = vector.shape_cast %4 : vector<1x32x168xf32> to vector<32x168xf32>
    %cst = arith.constant dense<0.000000e+00> : vector<28x168xf32>
    %6 = tpu.matmul %3, %5, %cst {dimension_numbers = #tpu.dot_dimension_numbers<[1], [0], [0], [1], [0, 0, 1, 1], [], []>} : vector<28x32xf32>, vector<32x168xf32>, vector<28x168xf32> -> vector<28x168xf32>
    %7 = vector.extract_strided_slice %1 {offsets = [1, 0], sizes = [28, 32], strides = [1, 1]} : vector<32x32xf32> to vector<28x32xf32>
    %c1 = arith.constant 1 : index
    %c0_7 = arith.constant 0 : index
    %c0_8 = arith.constant 0 : index
    %8 = vector.load %arg2[%c1, %c0_7, %c0_8] : memref<5x32x168xf32, #tpu.memory_space<vmem>>, vector<1x32x168xf32>
    %9 = vector.shape_cast %8 : vector<1x32x168xf32> to vector<32x168xf32>
    %cst_9 = arith.constant dense<0.000000e+00> : vector<28x168xf32>
    %10 = tpu.matmul %7, %9, %cst_9 {dimension_numbers = #tpu.dot_dimension_numbers<[1], [0], [0], [1], [0, 0, 1, 1], [], []>} : vector<28x32xf32>, vector<32x168xf32>, vector<28x168xf32> -> vector<28x168xf32>
    %11 = arith.addf %6, %10 : vector<28x168xf32>
    %12 = vector.extract_strided_slice %1 {offsets = [2, 0], sizes = [28, 32], strides = [1, 1]} : vector<32x32xf32> to vector<28x32xf32>
    %c2 = arith.constant 2 : index
    %c0_10 = arith.constant 0 : index
    %c0_11 = arith.constant 0 : index
    %13 = vector.load %arg2[%c2, %c0_10, %c0_11] : memref<5x32x168xf32, #tpu.memory_space<vmem>>, vector<1x32x168xf32>
    %14 = vector.shape_cast %13 : vector<1x32x168xf32> to vector<32x168xf32>
    %cst_12 = arith.constant dense<0.000000e+00> : vector<28x168xf32>
    %15 = tpu.matmul %12, %14, %cst_12 {dimension_numbers = #tpu.dot_dimension_numbers<[1], [0], [0], [1], [0, 0, 1, 1], [], []>} : vector<28x32xf32>, vector<32x168xf32>, vector<28x168xf32> -> vector<28x168xf32>
    %16 = arith.addf %11, %15 : vector<28x168xf32>
    %17 = vector.extract_strided_slice %1 {offsets = [3, 0], sizes = [28, 32], strides = [1, 1]} : vector<32x32xf32> to vector<28x32xf32>
    %c3 = arith.constant 3 : index
    %c0_13 = arith.constant 0 : index
    %c0_14 = arith.constant 0 : index
    %18 = vector.load %arg2[%c3, %c0_13, %c0_14] : memref<5x32x168xf32, #tpu.memory_space<vmem>>, vector<1x32x168xf32>
    %19 = vector.shape_cast %18 : vector<1x32x168xf32> to vector<32x168xf32>
    %cst_15 = arith.constant dense<0.000000e+00> : vector<28x168xf32>
    %20 = tpu.matmul %17, %19, %cst_15 {dimension_numbers = #tpu.dot_dimension_numbers<[1], [0], [0], [1], [0, 0, 1, 1], [], []>} : vector<28x32xf32>, vector<32x168xf32>, vector<28x168xf32> -> vector<28x168xf32>
    %21 = arith.addf %16, %20 : vector<28x168xf32>
    %22 = vector.extract_strided_slice %1 {offsets = [4, 0], sizes = [28, 32], strides = [1, 1]} : vector<32x32xf32> to vector<28x32xf32>
    %c4 = arith.constant 4 : index
    %c0_16 = arith.constant 0 : index
    %c0_17 = arith.constant 0 : index
    %23 = vector.load %arg2[%c4, %c0_16, %c0_17] : memref<5x32x168xf32, #tpu.memory_space<vmem>>, vector<1x32x168xf32>
    %24 = vector.shape_cast %23 : vector<1x32x168xf32> to vector<32x168xf32>
    %cst_18 = arith.constant dense<0.000000e+00> : vector<28x168xf32>
    %25 = tpu.matmul %22, %24, %cst_18 {dimension_numbers = #tpu.dot_dimension_numbers<[1], [0], [0], [1], [0, 0, 1, 1], [], []>} : vector<28x32xf32>, vector<32x168xf32>, vector<28x168xf32> -> vector<28x168xf32>
    %26 = arith.addf %21, %25 : vector<28x168xf32>
    %27 = vector.broadcast %2 : vector<1x168xf32> to vector<28x168xf32>
    %28 = arith.addf %26, %27 : vector<28x168xf32>
    %29 = vector.extract_strided_slice %28 {offsets = [0, 0], sizes = [28, 162], strides = [1, 1]} : vector<28x168xf32> to vector<28x162xf32>
    %30 = vector.extract_strided_slice %28 {offsets = [0, 6], sizes = [28, 162], strides = [1, 1]} : vector<28x168xf32> to vector<28x162xf32>
    %31 = arith.maximumf %29, %30 : vector<28x162xf32>
    %32 = vector.extract_strided_slice %31 {offsets = [0, 0], sizes = [27, 162], strides = [1, 1]} : vector<28x162xf32> to vector<27x162xf32>
    %33 = vector.extract_strided_slice %31 {offsets = [1, 0], sizes = [27, 162], strides = [1, 1]} : vector<28x162xf32> to vector<27x162xf32>
    %34 = arith.maximumf %32, %33 : vector<27x162xf32>
    %c0_19 = arith.constant 0 : index
    %c0_20 = arith.constant 0 : index
    %35 = vector.load %arg6[%c0_19, %c0_20] : memref<14x27xf32, #tpu.memory_space<vmem>>, vector<14x27xf32>
    %cst_21 = arith.constant dense<0.000000e+00> : vector<14x162xf32>
    %36 = tpu.matmul %35, %34, %cst_21 {dimension_numbers = #tpu.dot_dimension_numbers<[1], [0], [0], [1], [0, 0, 1, 1], [], []>} : vector<14x27xf32>, vector<27x162xf32>, vector<14x162xf32> -> vector<14x162xf32>
    %c0_22 = arith.constant 0 : index
    %c0_23 = arith.constant 0 : index
    %37 = vector.load %arg7[%c0_22, %c0_23] : memref<162x84xf32, #tpu.memory_space<vmem>>, vector<162x84xf32>
    %cst_24 = arith.constant dense<0.000000e+00> : vector<14x84xf32>
    %38 = tpu.matmul %36, %37, %cst_24 {dimension_numbers = #tpu.dot_dimension_numbers<[1], [0], [0], [1], [0, 0, 1, 1], [], []>} : vector<14x162xf32>, vector<162x84xf32>, vector<14x84xf32> -> vector<14x84xf32>
    %c0_25 = arith.constant 0 : index
    %c0_26 = arith.constant 0 : index
    %39 = vector.load %arg5[%c0_25, %c0_26] : memref<1x160xf32, #tpu.memory_space<vmem>>, vector<1x160xf32>
    %40 = vector.extract_strided_slice %38 {offsets = [0, 0], sizes = [10, 84], strides = [1, 1]} : vector<14x84xf32> to vector<10x84xf32>
    %c0_27 = arith.constant 0 : index
    %c0_28 = arith.constant 0 : index
    %c0_29 = arith.constant 0 : index
    %41 = vector.load %arg4[%c0_27, %c0_28, %c0_29] : memref<5x84x160xf32, #tpu.memory_space<vmem>>, vector<1x84x160xf32>
    %42 = vector.shape_cast %41 : vector<1x84x160xf32> to vector<84x160xf32>
    %cst_30 = arith.constant dense<0.000000e+00> : vector<10x160xf32>
    %43 = tpu.matmul %40, %42, %cst_30 {dimension_numbers = #tpu.dot_dimension_numbers<[1], [0], [0], [1], [0, 0, 1, 1], [], []>} : vector<10x84xf32>, vector<84x160xf32>, vector<10x160xf32> -> vector<10x160xf32>
    %44 = vector.extract_strided_slice %38 {offsets = [1, 0], sizes = [10, 84], strides = [1, 1]} : vector<14x84xf32> to vector<10x84xf32>
    %c1_31 = arith.constant 1 : index
    %c0_32 = arith.constant 0 : index
    %c0_33 = arith.constant 0 : index
    %45 = vector.load %arg4[%c1_31, %c0_32, %c0_33] : memref<5x84x160xf32, #tpu.memory_space<vmem>>, vector<1x84x160xf32>
    %46 = vector.shape_cast %45 : vector<1x84x160xf32> to vector<84x160xf32>
    %cst_34 = arith.constant dense<0.000000e+00> : vector<10x160xf32>
    %47 = tpu.matmul %44, %46, %cst_34 {dimension_numbers = #tpu.dot_dimension_numbers<[1], [0], [0], [1], [0, 0, 1, 1], [], []>} : vector<10x84xf32>, vector<84x160xf32>, vector<10x160xf32> -> vector<10x160xf32>
    %48 = arith.addf %43, %47 : vector<10x160xf32>
    %49 = vector.extract_strided_slice %38 {offsets = [2, 0], sizes = [10, 84], strides = [1, 1]} : vector<14x84xf32> to vector<10x84xf32>
    %c2_35 = arith.constant 2 : index
    %c0_36 = arith.constant 0 : index
    %c0_37 = arith.constant 0 : index
    %50 = vector.load %arg4[%c2_35, %c0_36, %c0_37] : memref<5x84x160xf32, #tpu.memory_space<vmem>>, vector<1x84x160xf32>
    %51 = vector.shape_cast %50 : vector<1x84x160xf32> to vector<84x160xf32>
    %cst_38 = arith.constant dense<0.000000e+00> : vector<10x160xf32>
    %52 = tpu.matmul %49, %51, %cst_38 {dimension_numbers = #tpu.dot_dimension_numbers<[1], [0], [0], [1], [0, 0, 1, 1], [], []>} : vector<10x84xf32>, vector<84x160xf32>, vector<10x160xf32> -> vector<10x160xf32>
    %53 = arith.addf %48, %52 : vector<10x160xf32>
    %54 = vector.extract_strided_slice %38 {offsets = [3, 0], sizes = [10, 84], strides = [1, 1]} : vector<14x84xf32> to vector<10x84xf32>
    %c3_39 = arith.constant 3 : index
    %c0_40 = arith.constant 0 : index
    %c0_41 = arith.constant 0 : index
    %55 = vector.load %arg4[%c3_39, %c0_40, %c0_41] : memref<5x84x160xf32, #tpu.memory_space<vmem>>, vector<1x84x160xf32>
    %56 = vector.shape_cast %55 : vector<1x84x160xf32> to vector<84x160xf32>
    %cst_42 = arith.constant dense<0.000000e+00> : vector<10x160xf32>
    %57 = tpu.matmul %54, %56, %cst_42 {dimension_numbers = #tpu.dot_dimension_numbers<[1], [0], [0], [1], [0, 0, 1, 1], [], []>} : vector<10x84xf32>, vector<84x160xf32>, vector<10x160xf32> -> vector<10x160xf32>
    %58 = arith.addf %53, %57 : vector<10x160xf32>
    %59 = vector.extract_strided_slice %38 {offsets = [4, 0], sizes = [10, 84], strides = [1, 1]} : vector<14x84xf32> to vector<10x84xf32>
    %c4_43 = arith.constant 4 : index
    %c0_44 = arith.constant 0 : index
    %c0_45 = arith.constant 0 : index
    %60 = vector.load %arg4[%c4_43, %c0_44, %c0_45] : memref<5x84x160xf32, #tpu.memory_space<vmem>>, vector<1x84x160xf32>
    %61 = vector.shape_cast %60 : vector<1x84x160xf32> to vector<84x160xf32>
    %cst_46 = arith.constant dense<0.000000e+00> : vector<10x160xf32>
    %62 = tpu.matmul %59, %61, %cst_46 {dimension_numbers = #tpu.dot_dimension_numbers<[1], [0], [0], [1], [0, 0, 1, 1], [], []>} : vector<10x84xf32>, vector<84x160xf32>, vector<10x160xf32> -> vector<10x160xf32>
    %63 = arith.addf %58, %62 : vector<10x160xf32>
    %64 = vector.broadcast %39 : vector<1x160xf32> to vector<10x160xf32>
    %65 = arith.addf %63, %64 : vector<10x160xf32>
    %66 = vector.extract_strided_slice %65 {offsets = [0, 0], sizes = [10, 144], strides = [1, 1]} : vector<10x160xf32> to vector<10x144xf32>
    %67 = vector.extract_strided_slice %65 {offsets = [0, 16], sizes = [10, 144], strides = [1, 1]} : vector<10x160xf32> to vector<10x144xf32>
    %68 = arith.maximumf %66, %67 : vector<10x144xf32>
    %69 = vector.extract_strided_slice %68 {offsets = [0, 0], sizes = [9, 144], strides = [1, 1]} : vector<10x144xf32> to vector<9x144xf32>
    %70 = vector.extract_strided_slice %68 {offsets = [1, 0], sizes = [9, 144], strides = [1, 1]} : vector<10x144xf32> to vector<9x144xf32>
    %71 = arith.maximumf %69, %70 : vector<9x144xf32>
    %c0_47 = arith.constant 0 : index
    %c0_48 = arith.constant 0 : index
    %72 = vector.load %arg8[%c0_47, %c0_48] : memref<144x50xf32, #tpu.memory_space<vmem>>, vector<144x50xf32>
    %cst_49 = arith.constant dense<0.000000e+00> : vector<9x50xf32>
    %73 = tpu.matmul %71, %72, %cst_49 {dimension_numbers = #tpu.dot_dimension_numbers<[1], [0], [0], [1], [0, 0, 1, 1], [], []>} : vector<9x144xf32>, vector<144x50xf32>, vector<9x50xf32> -> vector<9x50xf32>
    %c0_50 = arith.constant 0 : index
    %c0_51 = arith.constant 0 : index
    %74 = vector.load %arg9[%c0_50, %c0_51] : memref<1x10xf32, #tpu.memory_space<vmem>>, vector<1x10xf32>
    %75 = vector.extract_strided_slice %73 {offsets = [0, 0], sizes = [1, 10], strides = [1, 1]} : vector<9x50xf32> to vector<1x10xf32>
    %76 = arith.addf %74, %75 : vector<1x10xf32>
    %77 = vector.extract_strided_slice %73 {offsets = [2, 10], sizes = [1, 10], strides = [1, 1]} : vector<9x50xf32> to vector<1x10xf32>
    %78 = arith.addf %76, %77 : vector<1x10xf32>
    %79 = vector.extract_strided_slice %73 {offsets = [4, 20], sizes = [1, 10], strides = [1, 1]} : vector<9x50xf32> to vector<1x10xf32>
    %80 = arith.addf %78, %79 : vector<1x10xf32>
    %81 = vector.extract_strided_slice %73 {offsets = [6, 30], sizes = [1, 10], strides = [1, 1]} : vector<9x50xf32> to vector<1x10xf32>
    %82 = arith.addf %80, %81 : vector<1x10xf32>
    %83 = vector.extract_strided_slice %73 {offsets = [8, 40], sizes = [1, 10], strides = [1, 1]} : vector<9x50xf32> to vector<1x10xf32>
    %84 = arith.addf %82, %83 : vector<1x10xf32>
    %85 = vector.shape_cast %84 : vector<1x10xf32> to vector<1x1x10xf32>
    %c0_52 = arith.constant 0 : index
    %c0_53 = arith.constant 0 : index
    %c0_54 = arith.constant 0 : index
    %86 = vector.load %arg10[%c0_52, %c0_53, %c0_54] : memref<1x1x10xf32, #tpu.memory_space<vmem>>, vector<1x1x10xf32>
    tpu.vector_store %arg10[%c0_52, %c0_53, %c0_54], %85 {strides = array<i32>} : memref<1x1x10xf32, #tpu.memory_space<vmem>>, vector<1x1x10xf32>,
    return
  }
  func.func @transform_0(%arg0: i32) -> (i32, i32, i32) {
    %c0_i32 = arith.constant 0 : i32
    %c0_i32_0 = arith.constant 0 : i32
    %c0_i32_1 = arith.constant 0 : i32
    return %arg0, %c0_i32, %c0_i32_0 : i32, i32, i32
  }
  func.func @transform_1(%arg0: i32) -> (i32, i32, i32) {
    %c0_i32 = arith.constant 0 : i32
    %c0_i32_0 = arith.constant 0 : i32
    %c0_i32_1 = arith.constant 0 : i32
    %c0_i32_2 = arith.constant 0 : i32
    return %c0_i32, %c0_i32_0, %c0_i32_1 : i32, i32, i32
  }
  func.func @transform_2(%arg0: i32) -> (i32, i32) {
    %c0_i32 = arith.constant 0 : i32
    %c0_i32_0 = arith.constant 0 : i32
    %c0_i32_1 = arith.constant 0 : i32
    return %c0_i32, %c0_i32_0 : i32, i32
  }
  func.func @transform_3(%arg0: i32) -> (i32, i32, i32) {
    %c0_i32 = arith.constant 0 : i32
    %c0_i32_0 = arith.constant 0 : i32
    %c0_i32_1 = arith.constant 0 : i32
    %c0_i32_2 = arith.constant 0 : i32
    return %c0_i32, %c0_i32_0, %c0_i32_1 : i32, i32, i32
  }
  func.func @transform_4(%arg0: i32) -> (i32, i32) {
    %c0_i32 = arith.constant 0 : i32
    %c0_i32_0 = arith.constant 0 : i32
    %c0_i32_1 = arith.constant 0 : i32
    return %c0_i32, %c0_i32_0 : i32, i32
  }
  func.func @transform_5(%arg0: i32) -> (i32, i32) {
    %c0_i32 = arith.constant 0 : i32
    %c0_i32_0 = arith.constant 0 : i32
    %c0_i32_1 = arith.constant 0 : i32
    return %c0_i32, %c0_i32_0 : i32, i32
  }
  func.func @transform_6(%arg0: i32) -> (i32, i32) {
    %c0_i32 = arith.constant 0 : i32
    %c0_i32_0 = arith.constant 0 : i32
    %c0_i32_1 = arith.constant 0 : i32
    return %c0_i32, %c0_i32_0 : i32, i32
  }
  func.func @transform_7(%arg0: i32) -> (i32, i32) {
    %c0_i32 = arith.constant 0 : i32
    %c0_i32_0 = arith.constant 0 : i32
    %c0_i32_1 = arith.constant 0 : i32
    return %c0_i32, %c0_i32_0 : i32, i32
  }
  func.func @transform_8(%arg0: i32) -> (i32, i32) {
    %c0_i32 = arith.constant 0 : i32
    %c0_i32_0 = arith.constant 0 : i32
    %c0_i32_1 = arith.constant 0 : i32
    return %c0_i32, %c0_i32_0 : i32, i32
  }
  func.func @transform_9(%arg0: i32) -> (i32, i32, i32) {
    %c0_i32 = arith.constant 0 : i32
    %c0_i32_0 = arith.constant 0 : i32
    %c0_i32_1 = arith.constant 0 : i32
    return %arg0, %c0_i32, %c0_i32_0 : i32, i32, i32
  }
}

</mosaic_0001>

<bundles_post_ra>
// kernel: mynet_forward.1
= control target key start
LH: loop header
LB: loop body
LE: loop exit
PB: predicated region body
PF: predicated region fallthrough
CT: control target
= control target key end

     0   :  { %14 = vsyncpa [#allocation3], 0  ;;  %s3356_s0 = inlined_call_operand.vmem [shape: f32[2,32,32], index: 0, kind: input, shape index: {}]   ;;  %s3357_s1 = inlined_call_operand.vmem [shape: f32[5,32,168], index: 1, kind: input, shape index: {}]   ;;  %s3358_s2 = inlined_call_operand.vmem [shape: f32[1,168], index: 2, kind: input, shape index: {}]   ;;  %s3359_s3 = inlined_call_operand.vmem [shape: f32[5,84,160], index: 3, kind: input, shape index: {}]   ;;  %s3360_s4 = inlined_call_operand.vmem [shape: f32[1,160], index: 4, kind: input, shape index: {}]   ;;  %s3361_s5 = inlined_call_operand.vmem [shape: f32[14,27], index: 5, kind: input, shape index: {}]   ;;  %s3362_s6 = inlined_call_operand.vmem [shape: f32[162,84], index: 6, kind: input, shape index: {}]   ;;  %s3363_s7 = inlined_call_operand.vmem [shape: f32[144,50], index: 7, kind: input, shape index: {}]   ;;  %s3364_s8 = inlined_call_operand.vmem [shape: f32[1,10], index: 8, kind: input, shape index: {}]   ;;  %s3365_s9 = inlined_call_operand.hbm [shape: f32[2,1,10], index: 9, kind: output, shape index: {}]  }
   0x1   :  { %16 = vsyncpa [#allocation3 + $0x1], 0  ;;  %s2455_s30 = smov 0   ;;  %s2457_s10 = smov 0  }
   0x2   :  { %s2459_s11 = smov 0   ;;  %s2461_s12 = smov 0  }
   0x3 LB: > { %s2476_s13 = sadd.s32 4294967295, %s2394_s12   ;;  %s2095_s14 = sadd.s32 4294967294, %s2394_s12   ;;  %s2394_s12 = sphi %s2461_s12, %s3373_s12   ;;  %s2390_s11 = sphi %s2459_s11, %s3372_s11   ;;  %s2386_s10 = sphi %s2457_s10, %s3371_s10   ;;  %s2382_s30 = sphi %s2455_s30, %s3370_s30  }
   0x4   : > { %s2480_s15 = sadd.s32 1, %s2394_s12   ;;  %s223_s16 = sadd.s32 1, %s2390_s11 }
   0x5   : > { %s220_s17 = ssub.s32 %s2394_s12, %s2480_s15  ;;  %p233_p0 = scmp.ne.s32.totalorder %s2390_s11, %s2386_s10 }
   0x6   : > { %p221_p1 = scmp.eq.s32.totalorder %s220_s17, 0  ;;  %p234_p2 = scmp.eq.s32.totalorder %s2476_s13, 1 }
   0x7   : > { %p239_p3 = scmp.ne.s32.totalorder %s2386_s10, %s2382_s30  ;;  %p240_p4 = scmp.eq.s32.totalorder %s2095_s14, 1 }
   0x8   : > { %s2491_s18 = scalar_select %p221_p1, %s2390_s11, %s223_s16  }
   0x9   : > { %p2493_p5 = por %p234_p2, %p233_p0  ;;  %p2497_p6 = por %p240_p4, %p239_p3 }
   0xa   : > { %3366 = sst [smem:[#allocation5_spill]] %s2491_s18  ;;  %p2098_p7 = scmp.ge.s32.totalorder %s2394_s12, 1 }
   0xb   : > { %p290_p8 = scmp.lt.s32.totalorder %s2394_s12, 3 }
   0xd   : > { %p291_p9 = pnand %p2098_p7, %p290_p8 }
   0xe   : > { %p325_p10 = scmp.lt.s32.totalorder (!%p291_p9), %s2476_s13, 1  ;;  %s2397_s18 = smov (!%p291_p9), 122  }
   0xf   : > { %294 = sbr.rel (%p291_p9) target bundleno = 1525 (0x5f5), region = 56  ;;  %s2400_s26 = smov (!%p291_p9), 108  }
  0x10   : > { %s2401_s27 = smov (!%p291_p9), 118   ;;  %s2403_s29 = smov (!%p291_p9), 88  }
  0x11   : > { %s2270_s16 = sshll.u32 (!%p291_p9), %s2476_s13, 4 }
  0x12   : > { %s2038_s25 = scalar_lea.hbm (!%p291_p9), %s3365_s9, %s2270_s16 }
  0x14   : > { %v2108_v0 = vld [vmem:[%s3357_s1 + $0x78] sm:$0xff]  ;;  %v2107_v1 = vld [vmem:[%s3357_s1 + $0x70] sm:$0xff]  ;;  %v2106_v2 = vld [vmem:[%s3357_s1 + $0x68] sm:$0xff]  ;;  %v2396_v4 = vmov 0.0   ;;  %s326_s21 = scalar_select %p325_p10, %s2476_s13, 1  ;;  %vm356_vm0 = vcmask 1046528  }
  0x15   : > { %397 = vmatprep.subr.mxu0 %v2108_v0  ;;  %v2105_v3 = vld [vmem:[%s3357_s1 + $0x60] sm:$0xff]  ;;  %437 = vmatprep.mubr.f32.mxu0 %v2396_v4  ;;  %v2104_v5 = vld [vmem:[%s3357_s1 + $0x58] sm:$0xff]  ;;  %v2103_v6 = vld [vmem:[%s3357_s1 + $0x50] sm:$0xff]  ;;  %vm364_vm1 = vcmask 261120   ;;  %vm690_vm2 = vcmask 1044480   ;;  %vm568_vm3 = vcmask 1045504  }
  0x16   : > { %398 = vmatpush1.msra.mxu0 %v2107_v1  ;;  %v342_v7 = vld [vmem:[%s3357_s1 + $0x38] sm:$0xff]  ;;  %546 = vmatprep.mubr.f32.mxu1 %v2396_v4  ;;  %v341_v8 = vld [vmem:[%s3357_s1 + $0x30] sm:$0xff]  ;;  %v340_v9 = vld [vmem:[%s3357_s1 + $0x28] sm:$0xff]  ;;  %s2273_s17 = sshll.u32 %s326_s21, 5  ;;  %vm812_vm4 = vcmask 1043456   ;;  %vm1148_vm5 = vcmask 1041408  }
  0x17   : > { %399 = vmatprep.subr.mxu0 %v2106_v2  ;;  %2274 = vmatprep.subr.mxu1 %v342_v7  ;;  %v339_v10 = vld [vmem:[%s3357_s1 + $0x20] sm:$0xff]  ;;  %v2102_v11 = vld [vmem:[%s3357_s1 + $0x48] sm:$0xff]  ;;  %v338_v12 = vld [vmem:[%s3357_s1 + $0x18] sm:$0xff]  ;;  %s329_s28 = scalar_lea.vmem %s3356_s0, %s2273_s17  ;;  %vm968_vm6 = vcmask 998400   ;;  %vm1036_vm7 = vcmask 1042432   ;;  %vm1029_vm8 = vcmask 220160  }
  0x18   : > { %400 = vmatpush1.msra.mxu0 %v2105_v3  ;;  %2278 = vmatpush1.msra.mxu1 %v341_v8  ;;  %v2101_v13 = vld [vmem:[%s3357_s1 + $0x40] sm:$0xff]  ;;  %v337_v14 = vld [vmem:[%s3357_s1 + $0x10] sm:$0xff]  ;;  %v336_v15 = vld [vmem:[%s3357_s1 + $0x8] sm:$0xff]  ;;  %vm1141_vm9 = vcmask 277504   ;;  %vm1278_vm10 = vcmask 687104   ;;  %s2398_s17 = smov 112  }
  0x19   : > { %401 = vmatprep.subr.mxu0 %v2104_v5  ;;  %2275 = vmatprep.subr.mxu1 %v340_v9  ;;  %v2555_v16 = vld [vmem:[%s329_s28] sm:$0xff]  ;;  %v2557_v17 = vld [vmem:[%s329_s28 + $0x8] sm:$0xff]  ;;  %v2559_v18 = vld [vmem:[%s329_s28 + $0x10] sm:$0xff]  ;;  %vm1831_vm11 = vcmask 916480   ;;  %vm1878_vm12 = vcmask 130048   ;;  %vm2025_vm13 = vcmask 73728  }
  0x1a   : > { %402 = vmatpush1.msra.mxu0 %v2103_v6  ;;  %2279 = vmatpush1.msra.mxu1 %v339_v10  ;;  %v357_v19 = vrot.slane %v2555_v16, 1  ;;  %v358_v20 = vrot.slane %v2557_v17, 1  ;;  %v360_v21 = vrot.slane %v2559_v18, 1  ;;  %v335_v22 = vld [vmem:[%s3357_s1] sm:$0xff]  ;;  %v2567_v23 = vld [vmem:[%s329_s28 + $0x18] sm:$0xff]  ;;  %v2135_v30 = vld [vmem:[%s3357_s1 + $0xf0] sm:$0xff] }
  0x1b   : > { %403 = vmatprep.subr.mxu0 %v2102_v11  ;;  %2276 = vmatprep.subr.mxu1 %v338_v12  ;;  %v362_v26 = vrot.slane %v2567_v23, 1  ;;  %v2136_v27 = vld [vmem:[%s3357_s1 + $0xf8] sm:$0xff]  ;;  %v2134_v31 = vld [vmem:[%s3357_s1 + $0xe8] sm:$0xff]  ;;  %v2133_v32 = vld [vmem:[%s3357_s1 + $0xe0] sm:$0xff]  ;;  %v691_v34 = vrot.slane %v2555_v16, 3  ;;  %v692_v35 = vrot.slane %v2557_v17, 3 }
  0x1c   : > { %404 = vmatpush1.msra.mxu0 %v2101_v13  ;;  %2280 = vmatpush1.msra.mxu1 %v337_v14  ;;  %v359_v24 = vsel %vm356_vm0, %v357_v19, %v358_v20  ;;  %v361_v25 = vsel %vm356_vm0, %v358_v20, %v360_v21  ;;  %v2124_v29 = vld [vmem:[%s3357_s1 + $0xb8] sm:$0xff]  ;;  %v2131_v36 = vld [vmem:[%s3357_s1 + $0xd0] sm:$0xff]  ;;  %v2130_v37 = vld [vmem:[%s3357_s1 + $0xc8] sm:$0xff]  ;;  %v694_v42 = vrot.slane %v2559_v18, 3  ;;  %v569_v45 = vrot.slane %v2555_v16, 2  ;;  %s2402_s28 = smov 98  }
  0x1d   : > { %494 = vmatprep.subr.mxu0 %v342_v7  ;;  %2277 = vmatprep.subr.mxu1 %v336_v15  ;;  %v363_v28 = vsel %vm356_vm0, %v360_v21, %v362_v26  ;;  %v2132_v33 = vld [vmem:[%s3357_s1 + $0xd8] sm:$0xff]  ;;  %v2129_v38 = vld [vmem:[%s3357_s1 + $0xc0] sm:$0xff]  ;;  %v693_v39 = vsel %vm690_vm2, %v691_v34, %v692_v35  ;;  %v2123_v40 = vld [vmem:[%s3357_s1 + $0xb0] sm:$0xff]  ;;  %v570_v46 = vrot.slane %v2557_v17, 2  ;;  %v696_v50 = vrot.slane %v2567_v23, 3 }
  0x1e   : > { %2109 = vmatmul.mubr.msk.f32.vlgmr.msra.gmra.mxu0 %vm364_vm1, %v359_v24  ;;  %2281 = vmatpush1.msra.mxu1 %v335_v22  ;;  %v2122_v41 = vld [vmem:[%s3357_s1 + $0xa8] sm:$0xff]  ;;  %v2121_v43 = vld [vmem:[%s3357_s1 + $0xa0] sm:$0xff]  ;;  %v2120_v44 = vld [vmem:[%s3357_s1 + $0x98] sm:$0xff]  ;;  %v695_v49 = vsel %vm690_vm2, %v692_v35, %v694_v42  ;;  %v572_v53 = vrot.slane %v2559_v18, 2  ;;  %v574_v60 = vrot.slane %v2567_v23, 2  ;;  %v813_v2 = vrot.slane %v2555_v16, 4 }
  0x1f   : > { %443 = vmatprep.mubr.f32.mxu0 %v2396_v4  ;;  %495 = vmatpush1.msra.mxu0 %v341_v8  ;;  %v2119_v47 = vld [vmem:[%s3357_s1 + $0x90] sm:$0xff]  ;;  %v2118_v48 = vld [vmem:[%s3357_s1 + $0x88] sm:$0xff]  ;;  %v2117_v51 = vld [vmem:[%s3357_s1 + $0x80] sm:$0xff]  ;;  %v571_v52 = vsel %vm568_vm3, %v569_v45, %v570_v46  ;;  %v697_v57 = vsel %vm690_vm2, %v694_v42, %v696_v50  ;;  %v814_v3 = vrot.slane %v2557_v17, 4  ;;  %v816_v6 = vrot.slane %v2559_v18, 4 }
  0x20   : > { %2115 = vmatmul.mubr.msk.f32.vlgmr.msra.gmra.mxu1 %vm364_vm1, %v2559_v18  ;;  %496 = vmatprep.subr.mxu0 %v340_v9  ;;  %v2148_v54 = vld [vmem:[%s3357_s1 + $0x138] sm:$0xff]  ;;  %v2147_v55 = vld [vmem:[%s3357_s1 + $0x130] sm:$0xff]  ;;  %v2146_v56 = vld [vmem:[%s3357_s1 + $0x128] sm:$0xff]  ;;  %v573_v59 = vsel %vm568_vm3, %v570_v46, %v572_v53  ;;  %v575_v1 = vsel %vm568_vm3, %v572_v53, %v574_v60  ;;  %v818_v8 = vrot.slane %v2567_v23, 4 }
  0x21   : > { %497 = vmatpush1.msra.mxu0 %v339_v10  ;;  %552 = vmatprep.mubr.f32.mxu1 %v2396_v4  ;;  %v2145_v58 = vld [vmem:[%s3357_s1 + $0x120] sm:$0xff]  ;;  %v2144_v61 = vld [vmem:[%s3357_s1 + $0x118] sm:$0xff]  ;;  %v2143_v62 = vld [vmem:[%s3357_s1 + $0x110] sm:$0xff]  ;;  %v815_v5 = vsel %vm812_vm4, %v813_v2, %v814_v3  ;;  %v817_v7 = vsel %vm812_vm4, %v814_v3, %v816_v6 }
  0x22   : > { %2110 = vmatmul.mubr.msk.f32.gmra.mxu0 %vm364_vm1, %v361_v25  ;;  %498 = vmatprep.subr.mxu0 %v338_v12  ;;  %v2142_v63 = vld [vmem:[%s3357_s1 + $0x108] sm:$0xff]  ;;  %v2141_v0 = vld [vmem:[%s3357_s1 + $0x100] sm:$0xff]  ;;  %v819_v9 = vsel %vm812_vm4, %v816_v6, %v818_v8 }
  0x23   : > { %449 = vmatprep.mubr.f32.mxu0 %v2396_v4  ;;  %499 = vmatpush1.msra.mxu0 %v337_v14 }
  0x24   : > { %2116 = vmatmul.mubr.msk.f32.gmra.mxu1 %vm364_vm1, %v2567_v23  ;;  %500 = vmatprep.subr.mxu0 %v336_v15 }
  0x25   : > { %501 = vmatpush1.msra.mxu0 %v335_v22  ;;  %730 = vmatprep.subr.mxu1 %v2136_v27 }
  0x26   : > { %2111 = vmatmul.mubr.msk.f32.gmra.mxu0 %vm364_vm1, %v363_v28  ;;  %608 = vmatprep.subr.mxu0 %v2124_v29 }
  0x27   : > { %455 = vmatprep.mubr.f32.mxu0 %v2396_v4  ;;  %731 = vmatpush1.msra.mxu1 %v2135_v30 }
  0x28   : > { %732 = vmatprep.subr.mxu1 %v2134_v31  ;;  %770 = vmatprep.mubr.f32.mxu1 %v2396_v4 }
  0x29   : > { %733 = vmatpush1.msra.mxu1 %v2133_v32 }
  0x2a   : > { %2112 = vmatmul.mubr.msk.f32.gmra.mxu0 %vm364_vm1, %v362_v26  ;;  %734 = vmatprep.subr.mxu1 %v2132_v33 }
  0x2b   : > { %534 = vmatprep.mubr.f32.mxu0 %v2396_v4  ;;  %735 = vmatpush1.msra.mxu1 %v2131_v36 }
  0x2c   : > { %736 = vmatprep.subr.mxu1 %v2130_v37  ;;  %v926_v37 = vlaneseq }
  0x2d   : > { %737 = vmatpush1.msra.mxu1 %v2129_v38 }
  0x2e   : > { %2113 = vmatmul.mubr.msk.f32.vlgmr.msra.gmra.mxu0 %vm364_vm1, %v2555_v16  ;;  %2137 = vmatmul.mubr.msk.f32.vlgmr.msra.gmra.mxu1 %vm364_vm1, %v693_v39 }
  0x2f   : > { %609 = vmatpush1.msra.mxu0 %v2123_v40  ;;  %540 = vmatprep.mubr.f32.mxu0 %v2396_v4 }
  0x30   : > { %610 = vmatprep.subr.mxu0 %v2122_v41  ;;  %776 = vmatprep.mubr.f32.mxu1 %v2396_v4  ;;  %v2714_v41 = vshrl.u32 %v926_v37, 7  ;;  %v1132_v37 = vld [vmem:[%s3362_s6 + $0x60] sm:$0xff] }
  0x31   : > { %611 = vmatpush1.msra.mxu0 %v2121_v43 }
  0x32   : > { %2114 = vmatmul.mubr.msk.f32.gmra.mxu0 %vm364_vm1, %v2557_v17  ;;  %612 = vmatprep.subr.mxu0 %v2120_v44 }
  0x33   : > { %613 = vmatpush1.msra.mxu0 %v2119_v47  ;;  %648 = vmatprep.mubr.f32.mxu0 %v2396_v4  ;;  %v928_v47 = vsub.s32 0, %v2714_v41 }
  0x34   : > { %614 = vmatprep.subr.mxu0 %v2118_v48  ;;  %2138 = vmatmul.mubr.msk.f32.gmra.mxu1 %vm364_vm1, %v695_v49 }
  0x35   : > { %615 = vmatpush1.msra.mxu0 %v2117_v51  ;;  %782 = vmatprep.mubr.f32.mxu1 %v2396_v4  ;;  %v334_v51 = vld [vmem:[%s3358_s2] sm:$0x3] }
  0x36   : > { %2125 = vmatmul.mubr.msk.f32.vlgmr.msra.gmra.mxu0 %vm364_vm1, %v571_v52  ;;  %852 = vmatprep.subr.mxu0 %v2148_v54 }
  0x37   : > { %654 = vmatprep.mubr.f32.mxu0 %v2396_v4  ;;  %853 = vmatpush1.msra.mxu0 %v2147_v55 }
  0x38   : > { %854 = vmatprep.subr.mxu0 %v2146_v56  ;;  %2139 = vmatmul.mubr.msk.f32.gmra.mxu1 %vm364_vm1, %v697_v57 }
  0x39   : > { %855 = vmatpush1.msra.mxu0 %v2145_v58  ;;  %788 = vmatprep.mubr.f32.mxu1 %v2396_v4  ;;  %v929_v58 = vrot.slane %v334_v51, %v928_v47 }
  0x3a   : > { %2126 = vmatmul.mubr.msk.f32.gmra.mxu0 %vm364_vm1, %v573_v59  ;;  %856 = vmatprep.subr.mxu0 %v2144_v61  ;;  %v932_v59 = vsub.s32 1, %v2714_v41 }
  0x3b   : > { %660 = vmatprep.mubr.f32.mxu0 %v2396_v4  ;;  %857 = vmatpush1.msra.mxu0 %v2143_v62 }
  0x3c   : > { %2140 = vmatmul.mubr.msk.f32.gmra.mxu1 %vm364_vm1, %v696_v50  ;;  %858 = vmatprep.subr.mxu0 %v2142_v63 }
  0x3d   : > { %859 = vmatpush1.msra.mxu0 %v2141_v0  ;;  %1107 = vmatprep.mubr.f32.mxu1 %v2396_v4 }
  0x3e   : > { %2127 = vmatmul.mubr.msk.f32.gmra.mxu0 %vm364_vm1, %v575_v1  ;;  %1152 = vmatprep.subr.mxu0 %v2396_v4 }
  0x3f   : > { %666 = vmatprep.mubr.f32.mxu0 %v2396_v4 }
  0x42   : > { %2128 = vmatmul.mubr.msk.f32.gmra.mxu0 %vm364_vm1, %v574_v60 }
  0x43   : > { %892 = vmatprep.mubr.f32.mxu0 %v2396_v4 }
  0x46   : > { %2149 = vmatmul.mubr.msk.f32.vlgmr.msra.gmra.mxu0 %vm364_vm1, %v815_v5 }
  0x47   : > { %898 = vmatprep.mubr.f32.mxu0 %v2396_v4 }
  0x4a   : > { %2150 = vmatmul.mubr.msk.f32.gmra.mxu0 %vm364_vm1, %v817_v7 }
  0x4b   : > { %904 = vmatprep.mubr.f32.mxu0 %v2396_v4 }
  0x4e   : > { %2151 = vmatmul.mubr.msk.f32.gmra.mxu0 %vm364_vm1, %v819_v9 }
  0x4f   : > { %910 = vmatprep.mubr.f32.mxu0 %v2396_v4 }
  0x52   : > { %2152 = vmatmul.mubr.msk.f32.gmra.mxu0 %vm364_vm1, %v818_v8 }
  0xde   : > { %v2710_v10 = vpop.f32.mrf.mxu0 }
  0xe0   : > { %v441_v11 = vpop.f32.mrf.mxu0  ;;  %v548_v15 = vpop.f32.mrf.mxu1 }
  0xe2   : > { %v445_v12 = vpop.f32.mrf.mxu0  ;;  %v550_v17 = vpop.f32.mrf.mxu1 }
  0xe4   : > { %v447_v13 = vpop.f32.mrf.mxu0  ;;  %v554_v20 = vpop.f32.mrf.mxu1 }
  0xe6   : > { %v451_v14 = vpop.f32.mrf.mxu0  ;;  %v556_v23 = vpop.f32.mrf.mxu1 }
  0xe7   : > { %v549_v42 = vadd.f32 %v548_v15, %v451_v14 }
  0xe8   : > { %v453_v16 = vpop.f32.mrf.mxu0 }
  0xe9   : > { %v551_v45 = vadd.f32 %v550_v17, %v453_v16 }
  0xea   : > { %v457_v18 = vpop.f32.mrf.mxu0 }
  0xeb   : > { %v555_v49 = vadd.f32 %v554_v20, %v457_v18 }
  0xec   : > { %v459_v19 = vpop.f32.mrf.mxu0 }
  0xed   : > { %v557_v54 = vadd.f32 %v556_v23, %v459_v19 }
  0xee   : > { %v536_v21 = vpop.f32.mrf.mxu0  ;;  %v2712_v26 = vpop.f32.mrf.mxu1 }
  0xf0   : > { %v538_v22 = vpop.f32.mrf.mxu0  ;;  %v774_v29 = vpop.f32.mrf.mxu1 }
  0xf1   : > { %v539_v1 = vadd.f32 %v538_v22, %v441_v11  ;;  %v537_v11 = vadd.f32 %v536_v21, %v2710_v10 }
  0xf2   : > { %v542_v24 = vpop.f32.mrf.mxu0 }
  0xf3   : > { %v543_v5 = vadd.f32 %v542_v24, %v445_v12 }
  0xf4   : > { %v544_v25 = vpop.f32.mrf.mxu0  ;;  %v778_v32 = vpop.f32.mrf.mxu1 }
  0xf5   : > { %v545_v55 = vadd.f32 %v544_v25, %v447_v13  ;;  %v933_v13 = vrot.slane %v334_v51, %v932_v59  ;;  %v1120_v51 = vld [vmem:[%s3362_s6] sm:$0xff] }
  0xf6   : > { %v650_v27 = vpop.f32.mrf.mxu0  ;;  %v780_v34 = vpop.f32.mrf.mxu1 }
  0xf7   : > { %v673_v24 = vadd.f32 %v650_v27, %v537_v11 }
  0xf8   : > { %v652_v28 = vpop.f32.mrf.mxu0  ;;  %v784_v38 = vpop.f32.mrf.mxu1 }
  0xf9   : > { %v674_v9 = vadd.f32 %v652_v28, %v539_v1  ;;  %v795_v10 = vadd.f32 %v2712_v26, %v673_v24  ;;  %v1135_v26 = vld [vmem:[%s3362_s6 + $0x78] sm:$0xff] }
  0xfa   : > { %v656_v30 = vpop.f32.mrf.mxu0  ;;  %v786_v43 = vpop.f32.mrf.mxu1  ;;  %1153 = vmatpush1.msra.mxu0 %v1135_v26 }
  0xfb   : > { %v675_v15 = vadd.f32 %v656_v30, %v543_v5  ;;  %v796_v25 = vadd.f32 %v774_v29, %v674_v9  ;;  %1154 = vmatprep.subr.mxu0 %v2396_v4 }
  0xfc   : > { %v658_v31 = vpop.f32.mrf.mxu0  ;;  %v790_v52 = vpop.f32.mrf.mxu1 }
  0xfd   : > { %v676_v61 = vadd.f32 %v658_v31, %v545_v55  ;;  %v797_v28 = vadd.f32 %v778_v32, %v675_v15 }
  0xfe   : > { %v662_v33 = vpop.f32.mrf.mxu0  ;;  %v792_v2 = vpop.f32.mrf.mxu1 }
  0xff   : > { %v677_v46 = vadd.f32 %v662_v33, %v549_v42  ;;  %v798_v16 = vadd.f32 %v780_v34, %v676_v61  ;;  %v1128_v42 = vld [vmem:[%s3362_s6 + $0x40] sm:$0xff] }
 0x100   : > { %v664_v35 = vpop.f32.mrf.mxu0 }
 0x101   : > { %v678_v50 = vadd.f32 %v664_v35, %v551_v45  ;;  %v799_v56 = vadd.f32 %v784_v38, %v677_v46  ;;  %v1134_v35 = vld [vmem:[%s3362_s6 + $0x70] sm:$0xff]  ;;  %v1131_v38 = vld [vmem:[%s3362_s6 + $0x58] sm:$0xff]  ;;  %v1125_v45 = vld [vmem:[%s3362_s6 + $0x28] sm:$0xff] }
 0x102   : > { %v668_v36 = vpop.f32.mrf.mxu0  ;;  %1155 = vmatpush1.msra.mxu0 %v1134_v35  ;;  %v1124_v46 = vld [vmem:[%s3362_s6 + $0x20] sm:$0xff] }
 0x103   : > { %v679_v57 = vadd.f32 %v668_v36, %v555_v49  ;;  %v800_v62 = vadd.f32 %v786_v43, %v678_v50  ;;  %v1133_v36 = vld [vmem:[%s3362_s6 + $0x68] sm:$0xff]  ;;  %1156 = vmatprep.subr.mxu0 %v2396_v4  ;;  %v1127_v43 = vld [vmem:[%s3362_s6 + $0x38] sm:$0xff]  ;;  %v1122_v49 = vld [vmem:[%s3362_s6 + $0x10] sm:$0xff] }
 0x104   : > { %v670_v39 = vpop.f32.mrf.mxu0  ;;  %1157 = vmatpush1.msra.mxu0 %v1133_v36  ;;  %v1121_v50 = vld [vmem:[%s3362_s6 + $0x8] sm:$0xff]  ;;  %v1027_v36 = vld [vmem:[%s3361_s5] sm:$0xff] }
 0x105   : > { %v680_v63 = vadd.f32 %v670_v39, %v557_v54  ;;  %v801_v6 = vadd.f32 %v790_v52, %v679_v57  ;;  %1158 = vmatprep.subr.mxu0 %v2396_v4  ;;  %v1130_v39 = vld [vmem:[%s3362_s6 + $0x50] sm:$0xff]  ;;  %v1140_v52 = vld [vmem:[%s3362_s6 + $0xa0] sm:$0x3] }
 0x106   : > { %v894_v40 = vpop.f32.mrf.mxu0  ;;  %1159 = vmatpush1.msra.mxu0 %v1132_v37  ;;  %v1138_v54 = vld [vmem:[%s3362_s6 + $0x90] sm:$0xff]  ;;  %v1137_v37 = vld [vmem:[%s3362_s6 + $0x88] sm:$0xff] }
 0x107   : > { %v802_v17 = vadd.f32 %v792_v2, %v680_v63  ;;  %v917_v21 = vadd.f32 %v894_v40, %v795_v10  ;;  %1160 = vmatprep.subr.mxu0 %v2396_v4  ;;  %v1129_v40 = vld [vmem:[%s3362_s6 + $0x48] sm:$0xff] }
 0x108   : > { %v896_v44 = vpop.f32.mrf.mxu0  ;;  %1161 = vmatpush1.msra.mxu0 %v1131_v38  ;;  %v1136_v38 = vld [vmem:[%s3362_s6 + $0x80] sm:$0xff] }
 0x109   : > { %v918_v30 = vadd.f32 %v896_v44, %v796_v25  ;;  %v2748_v32 = vadd.f32 %v929_v58, %v917_v21  ;;  %1162 = vmatprep.subr.mxu0 %v2396_v4  ;;  %v1126_v44 = vld [vmem:[%s3362_s6 + $0x30] sm:$0xff] }
 0x10a   : > { %v900_v48 = vpop.f32.mrf.mxu0  ;;  %1163 = vmatpush1.msra.mxu0 %v1130_v39  ;;  %v2181_v39 = vld [vmem:[%s3359_s3 + $0x158] sm:$0xf] }
 0x10b   : > { %v919_v31 = vadd.f32 %v900_v48, %v797_v28  ;;  %v2742_v27 = vadd.f32 %v933_v13, %v918_v30  ;;  %1164 = vmatprep.subr.mxu0 %v2396_v4  ;;  %v1123_v48 = vld [vmem:[%s3362_s6 + $0x18] sm:$0xff] }
 0x10c   : > { %v902_v53 = vpop.f32.mrf.mxu0  ;;  %1165 = vmatpush1.msra.mxu0 %v1129_v40  ;;  %v2211_v40 = vld [vmem:[%s3359_s3 + $0x208] sm:$0xf] }
 0x10d   : > { %v920_v12 = vadd.f32 %v902_v53, %v798_v16  ;;  %v2744_v29 = vadd.f32 %v929_v58, %v919_v31  ;;  %1166 = vmatprep.subr.mxu0 %v2396_v4  ;;  %v1139_v53 = vld [vmem:[%s3362_s6 + $0x98] sm:$0xff] }
 0x10e   : > { %v906_v60 = vpop.f32.mrf.mxu0  ;;  %1167 = vmatpush1.msra.mxu0 %v1128_v42  ;;  %v2180_v42 = vld [vmem:[%s3359_s3 + $0x150] sm:$0xf] }
 0x10f   : > { %v921_v0 = vadd.f32 %v906_v60, %v799_v56  ;;  %v2735_v33 = vadd.f32 %v933_v13, %v920_v12  ;;  %1168 = vmatprep.subr.mxu0 %v2396_v4 }
 0x110   : > { %v908_v3 = vpop.f32.mrf.mxu0  ;;  %1169 = vmatpush1.msra.mxu0 %v1127_v43  ;;  %v2179_v43 = vld [vmem:[%s3359_s3 + $0x148] sm:$0xff] }
 0x111   : > { %v922_v7 = vadd.f32 %v908_v3, %v800_v62  ;;  %v2723_v8 = vadd.f32 %v929_v58, %v921_v0  ;;  %1170 = vmatprep.subr.mxu0 %v2396_v4 }
 0x112   : > { %v912_v14 = vpop.f32.mrf.mxu0  ;;  %1171 = vmatpush1.msra.mxu0 %v1126_v44  ;;  %v2178_v44 = vld [vmem:[%s3359_s3 + $0x140] sm:$0xff] }
 0x113   : > { %v923_v18 = vadd.f32 %v912_v14, %v801_v6  ;;  %960 = vrot.lane.b32.xlu1 %v2723_v8, %s2397_s18  ;;  %v2729_v20 = vadd.f32 %v933_v13, %v922_v7  ;;  %1172 = vmatprep.subr.mxu0 %v2396_v4 }
 0x114   : > { %v914_v19 = vpop.f32.mrf.mxu0  ;;  %1173 = vmatpush1.msra.mxu0 %v1125_v45  ;;  %v2177_v45 = vld [vmem:[%s3359_s3 + $0x138] sm:$0xff] }
 0x115   : > { %v924_v22 = vadd.f32 %v914_v19, %v802_v17  ;;  %v2731_v23 = vadd.f32 %v929_v58, %v923_v18  ;;  %1174 = vmatprep.subr.mxu0 %v2396_v4 }
 0x116   : > { %1175 = vmatpush1.msra.mxu0 %v1124_v46  ;;  %v2176_v46 = vld [vmem:[%s3359_s3 + $0x130] sm:$0xff] }
 0x117   : > { %962 = vrot.lane.b32.xlu1 %v2729_v20, %s2397_s18  ;;  %964 = vrot.lane.b32.xlu0 %v2731_v23, %s2397_s18  ;;  %v2737_v34 = vadd.f32 %v933_v13, %v924_v22 }
 0x118   : > { %1176 = vmatprep.subr.mxu0 %v2396_v4 }
 0x119   : > { %1177 = vmatpush1.msra.mxu0 %v1123_v48  ;;  %v2175_v48 = vld [vmem:[%s3359_s3 + $0x128] sm:$0xff] }
 0x11a   : > { %1178 = vmatprep.subr.mxu0 %v2396_v4 }
 0x11b   : > { %966 = vrot.lane.b32.xlu0 %v2737_v34, %s2397_s18  ;;  %958 = vrot.lane.b32.xlu1 %v2735_v33, %s2397_s18 }
 0x11c   : > { %1179 = vmatpush1.msra.mxu0 %v1122_v49  ;;  %v2174_v49 = vld [vmem:[%s3359_s3 + $0x120] sm:$0xff] }
 0x11d   : > { %1180 = vmatprep.subr.mxu0 %v2396_v4 }
 0x11e   : > { %1181 = vmatpush1.msra.mxu0 %v1121_v50  ;;  %v2173_v50 = vld [vmem:[%s3359_s3 + $0x118] sm:$0xff] }
 0x11f   : > { %956 = vrot.lane.b32.xlu0 %v2744_v29, %s2397_s18  ;;  %954 = vrot.lane.b32.xlu1 %v2742_v27, %s2397_s18 }
 0x120   : > { %1182 = vmatprep.subr.mxu0 %v2396_v4 }
 0x121   : > { %1183 = vmatpush1.msra.mxu0 %v1120_v51  ;;  %v2172_v51 = vld [vmem:[%s3359_s3 + $0x110] sm:$0xff] }
 0x122   : > { %1206 = vmatprep.subr.mxu0 %v2396_v4 }
 0x123   : > { %952 = vrot.lane.b32.xlu0 %v2748_v32, %s2397_s18  ;;  %2157 = vmatpush2.msk.msra.mxu0 %vm1148_vm5, %v1140_v52  ;;  %v2171_v52 = vld [vmem:[%s3359_s3 + $0x108] sm:$0xff]  ;;  %s323_s18 = sand.u32 1, %s2386_s10  }
 0x124   : > { %1208 = vmatprep.subr.mxu0 %v2396_v4 }
 0x125   : > { %1209 = vmatpush2.msra.mxu0 %v1139_v53  ;;  %v2170_v53 = vld [vmem:[%s3359_s3 + $0x100] sm:$0xff] }
 0x126   : > { %1210 = vmatprep.subr.mxu0 %v2396_v4 }
 0x127   : > { %1211 = vmatpush2.msra.mxu0 %v1138_v54  ;;  %v2169_v54 = vld [vmem:[%s3359_s3 + $0xf8] sm:$0xff] }
 0x128   : > { %1212 = vmatprep.subr.mxu0 %v2396_v4 }
 0x129   : > { %1213 = vmatpush2.msra.mxu0 %v1137_v37  ;;  %v1248_v37 = vld [vmem:[%s3359_s3 + $0xa0] sm:$0xf] }
 0x12a   : > { %1214 = vmatprep.subr.mxu0 %v2396_v4 }
 0x12b   : > { %1215 = vmatpush2.msra.mxu0 %v1136_v38  ;;  %v2262_v38 = vld [vmem:[%s3359_s3 + $0x360] sm:$0xf] }
 0x12c   : > { %2212 = vmatprep.subr.msk.mxu0 %vm812_vm4, %v2211_v40 }
 0x185   : > { %v961_v55 = vpop.permute.xlu1 %960 }
 0x189   : > { %v963_v56 = vpop.permute.xlu1 %962  ;;  %v965_v57 = vpop.permute.xlu0 %964 }
 0x18a   : > { %v971_v58 = vsel %vm968_vm6, %v961_v55, %v963_v56  ;;  %v986_v60 = vmax.f32 %v2729_v20, %v963_v56  ;;  %v2168_v55 = vld [vmem:[%s3359_s3 + $0xf0] sm:$0xff]  ;;  %v2167_v56 = vld [vmem:[%s3359_s3 + $0xe8] sm:$0xff] }
 0x18b   : > { %v985_v63 = vmax.f32 %v2723_v8, %v971_v58 }
 0x18c   : > { %v1005_v7 = vrot.slane %v986_v60, 1 }
 0x18d   : > { %v967_v61 = vpop.permute.xlu0 %966  ;;  %v959_v62 = vpop.permute.xlu1 %958  ;;  %v1003_v15 = vrot.slane %v985_v63, 1 }
 0x18e   : > { %v972_v0 = vsel %vm968_vm6, %v965_v57, %v967_v61  ;;  %v988_v1 = vmax.f32 %v2737_v34, %v967_v61  ;;  %v984_v2 = vmax.f32 %v2735_v33, %v959_v62  ;;  %v2209_v61 = vld [vmem:[%s3359_s3 + $0x1f8] sm:$0xff] }
 0x18f   : > { %v987_v3 = vmax.f32 %v2731_v23, %v972_v0  ;;  %v2207_v0 = vld [vmem:[%s3359_s3 + $0x1e8] sm:$0xff] }
 0x190   : > { %v1009_v5 = vrot.slane %v988_v1, 1  ;;  %v1001_v6 = vrot.slane %v984_v2, 1 }
 0x191   : > { %v1007_v9 = vrot.slane %v987_v3, 1  ;;  %v957_v13 = vpop.permute.xlu0 %956  ;;  %v955_v14 = vpop.permute.xlu1 %954 }
 0x192   : > { %v1026_v16 = vmax.f32 %v988_v1, %v1009_v5  ;;  %v970_v17 = vsel %vm968_vm6, %v957_v13, %v959_v62  ;;  %v982_v8 = vmax.f32 %v2742_v27, %v955_v14  ;;  %v1006_v11 = vsel %vm356_vm0, %v1001_v6, %v1005_v7  ;;  %v2200_v13 = vld [vmem:[%s3359_s3 + $0x1b0] sm:$0xff] }
 0x193   : > { %v1025_v18 = vmax.f32 %v987_v3, %v1007_v9  ;;  %v983_v19 = vmax.f32 %v2744_v29, %v970_v17  ;;  %v1010_v12 = vsel %vm356_vm0, %v1005_v7, %v1009_v5  ;;  %v1008_v23 = vsel %vm356_vm0, %v1003_v15, %v1007_v9  ;;  %v2205_v3 = vld [vmem:[%s3359_s3 + $0x1d8] sm:$0xff]  ;;  %v2204_v5 = vld [vmem:[%s3359_s3 + $0x1d0] sm:$0xff]  ;;  %v2202_v7 = vld [vmem:[%s3359_s3 + $0x1c0] sm:$0xff] }
 0x194   : > { %v1000_v20 = vrot.slane %v982_v8, 1  ;;  %2153 = vmatprep.subr.msk.mxu1 %vm1036_vm7, %v1026_v16  ;;  %v1024_v22 = vmax.f32 %v986_v60, %v1010_v12  ;;  %v1023_v28 = vmax.f32 %v985_v63, %v1008_v23  ;;  %v1022_v30 = vmax.f32 %v984_v2, %v1006_v11  ;;  %v2210_v60 = vld [vmem:[%s3359_s3 + $0x200] sm:$0xf]  ;;  %v2208_v63 = vld [vmem:[%s3359_s3 + $0x1f0] sm:$0xff]  ;;  %v2201_v9 = vld [vmem:[%s3359_s3 + $0x1b8] sm:$0xff] }
 0x195   : > { %v998_v24 = vrot.slane %v983_v19, 1  ;;  %2154 = vmatpush1.msk.msra.mxu1 %vm1036_vm7, %v1025_v18  ;;  %v953_v25 = vpop.permute.xlu0 %952  ;;  %v2206_v2 = vld [vmem:[%s3359_s3 + $0x1e0] sm:$0xff]  ;;  %v2197_v16 = vld [vmem:[%s3359_s3 + $0x198] sm:$0xff]  ;;  %v2195_v11 = vld [vmem:[%s3359_s3 + $0x188] sm:$0xff] }
 0x196   : > { %v1002_v31 = vsel %vm356_vm0, %v1000_v20, %v1001_v6  ;;  %v969_v33 = vsel %vm968_vm6, %v953_v25, %v955_v14  ;;  %1069 = vmatprep.subr.mxu1 %v1024_v22  ;;  %v2203_v6 = vld [vmem:[%s3359_s3 + $0x1c8] sm:$0xff]  ;;  %v2166_v17 = vld [vmem:[%s3359_s3 + $0xe0] sm:$0xff]  ;;  %v2165_v18 = vld [vmem:[%s3359_s3 + $0xd8] sm:$0xff] }
 0x197   : > { %v1004_v34 = vsel %vm356_vm0, %v998_v24, %v1003_v15  ;;  %v981_v10 = vmax.f32 %v2748_v32, %v969_v33  ;;  %1070 = vmatpush1.msra.mxu1 %v1023_v28  ;;  %v1020_v27 = vmax.f32 %v982_v8, %v1002_v31  ;;  %v1028_v32 = vld [vmem:[%s3361_s5 + $0x8] sm:$0x3f]  ;;  %v2198_v15 = vld [vmem:[%s3359_s3 + $0x1a0] sm:$0xff]  ;;  %v2196_v8 = vld [vmem:[%s3359_s3 + $0x190] sm:$0xff] }
 0x198   : > { %v1021_v21 = vmax.f32 %v983_v19, %v1004_v34  ;;  %1071 = vmatprep.subr.mxu1 %v1022_v30  ;;  %v2199_v14 = vld [vmem:[%s3359_s3 + $0x1a8] sm:$0xff]  ;;  %v2164_v19 = vld [vmem:[%s3359_s3 + $0xd0] sm:$0xff]  ;;  %v2194_v12 = vld [vmem:[%s3359_s3 + $0x180] sm:$0xff] }
 0x199   : > { %v997_v29 = vrot.slane %v981_v10, 1  ;;  %v2163_v20 = vld [vmem:[%s3359_s3 + $0xc8] sm:$0xff]  ;;  %v2193_v22 = vld [vmem:[%s3359_s3 + $0x178] sm:$0xff]  ;;  %v2162_v23 = vld [vmem:[%s3359_s3 + $0xc0] sm:$0xff] }
 0x19a   : > { %1072 = vmatpush1.msra.mxu1 %v1021_v21  ;;  %v2161_v25 = vld [vmem:[%s3359_s3 + $0xb8] sm:$0xff]  ;;  %v2191_v28 = vld [vmem:[%s3359_s3 + $0x168] sm:$0xff]  ;;  %v2160_v30 = vld [vmem:[%s3359_s3 + $0xb0] sm:$0xff] }
 0x19b   : > { %v999_v26 = vsel %vm356_vm0, %v997_v29, %v998_v24  ;;  %1073 = vmatprep.subr.mxu1 %v1020_v27  ;;  %v2192_v24 = vld [vmem:[%s3359_s3 + $0x170] sm:$0xff]  ;;  %v2190_v31 = vld [vmem:[%s3359_s3 + $0x160] sm:$0xff]  ;;  %v1249_v33 = vld [vmem:[%s3359_s3 + $0xa8] sm:$0xf] }
 0x19c   : > { %v1019_v35 = vmax.f32 %v981_v10, %v999_v26  ;;  %v2263_v34 = vld [vmem:[%s3359_s3 + $0x368] sm:$0xf] }
 0x19e   : > { %1074 = vmatpush1.msra.mxu1 %v1019_v35 }
 0x19f   : > { %2155 = vmatmul.mubr.msk.f32.vlgmr.msra.gmra.mxu1 %vm1029_vm8, %v1027_v36  ;;  %2182 = vmatprep.subr.msk.mxu1 %vm812_vm4, %v2181_v39 }
 0x1a0   : > { %1113 = vmatprep.mubr.f32.mxu1 %v2396_v4  ;;  %2183 = vmatpush1.msk.msra.mxu1 %vm812_vm4, %v2180_v42  ;;  %v1247_v42 = vld [vmem:[%s3359_s3 + $0x98] sm:$0xff] }
 0x1a1   : > { %1301 = vmatprep.subr.mxu1 %v2179_v43  ;;  %v2261_v43 = vld [vmem:[%s3359_s3 + $0x358] sm:$0xff] }
 0x1a2   : > { %1302 = vmatpush1.msra.mxu1 %v2178_v44  ;;  %v1246_v44 = vld [vmem:[%s3359_s3 + $0x90] sm:$0xff] }
 0x1a3   : > { %2156 = vmatmul.mubr.msk.f32.gmra.mxu1 %vm1029_vm8, %v1028_v32  ;;  %1303 = vmatprep.subr.mxu1 %v2177_v45  ;;  %v2260_v45 = vld [vmem:[%s3359_s3 + $0x350] sm:$0xff] }
 0x1a4   : > { %1353 = vmatprep.mubr.f32.mxu1 %v2396_v4  ;;  %1304 = vmatpush1.msra.mxu1 %v2176_v46  ;;  %v1245_v46 = vld [vmem:[%s3359_s3 + $0x88] sm:$0xff] }
 0x1a5   : > { %1305 = vmatprep.subr.mxu1 %v2175_v48  ;;  %v2259_v48 = vld [vmem:[%s3359_s3 + $0x348] sm:$0xff] }
 0x1a6   : > { %1306 = vmatpush1.msra.mxu1 %v2174_v49  ;;  %v1244_v49 = vld [vmem:[%s3359_s3 + $0x80] sm:$0xff] }
 0x1a7   : > { %1307 = vmatprep.subr.mxu1 %v2173_v50  ;;  %v2258_v50 = vld [vmem:[%s3359_s3 + $0x340] sm:$0xff] }
 0x1a8   : > { %1308 = vmatpush1.msra.mxu1 %v2172_v51  ;;  %v1243_v51 = vld [vmem:[%s3359_s3 + $0x78] sm:$0xff] }
 0x1a9   : > { %1309 = vmatprep.subr.mxu1 %v2171_v52  ;;  %v2257_v52 = vld [vmem:[%s3359_s3 + $0x338] sm:$0xff] }
 0x1aa   : > { %1310 = vmatpush1.msra.mxu1 %v2170_v53  ;;  %v1242_v53 = vld [vmem:[%s3359_s3 + $0x70] sm:$0xff] }
 0x1ab   : > { %1311 = vmatprep.subr.mxu1 %v2169_v54  ;;  %v2256_v54 = vld [vmem:[%s3359_s3 + $0x330] sm:$0xff] }
 0x1ac   : > { %1312 = vmatpush1.msra.mxu1 %v2168_v55  ;;  %v1241_v55 = vld [vmem:[%s3359_s3 + $0x68] sm:$0xff] }
 0x1ad   : > { %1313 = vmatprep.subr.mxu1 %v2167_v56  ;;  %v2255_v56 = vld [vmem:[%s3359_s3 + $0x328] sm:$0xff] }
 0x1ae   : > { %1314 = vmatpush1.msra.mxu1 %v2166_v17  ;;  %v1231_v17 = vld [vmem:[%s3359_s3 + $0x18] sm:$0xff] }
 0x1af   : > { %1315 = vmatprep.subr.mxu1 %v2165_v18  ;;  %v1230_v18 = vld [vmem:[%s3359_s3 + $0x10] sm:$0xff] }
 0x1b0   : > { %1316 = vmatpush1.msra.mxu1 %v2164_v19  ;;  %v1229_v19 = vld [vmem:[%s3359_s3 + $0x8] sm:$0xff] }
 0x1b1   : > { %1317 = vmatprep.subr.mxu1 %v2163_v20  ;;  %v1228_v20 = vld [vmem:[%s3359_s3] sm:$0xff] }
 0x1b2   : > { %1318 = vmatpush1.msra.mxu1 %v2162_v23  ;;  %v2242_v23 = vld [vmem:[%s3359_s3 + $0x2c0] sm:$0xff] }
 0x1b3   : > { %1319 = vmatprep.subr.mxu1 %v2161_v25 }
 0x1b4   : > { %1320 = vmatpush1.msra.mxu1 %v2160_v30  ;;  %v2235_v30 = vld [vmem:[%s3359_s3 + $0x2a8] sm:$0xff] }
 0x1b5   : > { %2186 = vmatprep.subr.msk.mxu1 %vm812_vm4, %v1249_v33  ;;  %v2234_v33 = vld [vmem:[%s3359_s3 + $0x2a0] sm:$0xff] }
 0x25f   : > { %v1109_v57 = vpop.f32.mrf.mxu1 }
 0x261   : > { %v1111_v58 = vpop.f32.mrf.mxu1 }
 0x262   : > { %2158 = vmatprep.mubr.msk.f32.mxu0 %vm1141_vm9, %v1111_v58  ;;  %v2254_v58 = vld [vmem:[%s3359_s3 + $0x320] sm:$0xff] }
 0x263   : > { %v1115_v62 = vpop.f32.mrf.mxu1  ;;  %1217 = vmatmul.mubr.f32.vlgmr.msra.gmra.mxu0 %v1109_v57  ;;  %v1240_v57 = vld [vmem:[%s3359_s3 + $0x60] sm:$0xff] }
 0x264   : > { %2213 = vmatpush1.msk.msra.mxu0 %vm812_vm4, %v2210_v60  ;;  %v1239_v60 = vld [vmem:[%s3359_s3 + $0x58] sm:$0xff] }
 0x265   : > { %v1117_v1 = vpop.f32.mrf.mxu1  ;;  %1501 = vmatprep.subr.mxu0 %v2209_v61  ;;  %v2253_v61 = vld [vmem:[%s3359_s3 + $0x318] sm:$0xff] }
 0x266   : > { %2159 = vmatprep.mubr.msk.f32.mxu0 %vm1141_vm9, %v1117_v1  ;;  %1502 = vmatpush1.msra.mxu0 %v2208_v63  ;;  %v2252_v63 = vld [vmem:[%s3359_s3 + $0x310] sm:$0xff]  ;;  %v2251_v1 = vld [vmem:[%s3359_s3 + $0x308] sm:$0xff] }
 0x267   : > { %1222 = vmatmul.mubr.f32.gmra.mxu0 %v1115_v62  ;;  %1503 = vmatprep.subr.mxu0 %v2207_v0  ;;  %v1238_v62 = vld [vmem:[%s3359_s3 + $0x50] sm:$0xff]  ;;  %v1237_v0 = vld [vmem:[%s3359_s3 + $0x48] sm:$0xff] }
 0x268   : > { %1504 = vmatpush1.msra.mxu0 %v2206_v2  ;;  %1553 = vmatprep.mubr.f32.mxu0 %v2396_v4  ;;  %v1236_v2 = vld [vmem:[%s3359_s3 + $0x40] sm:$0xff] }
 0x269   : > { %1505 = vmatprep.subr.mxu0 %v2205_v3  ;;  %v2250_v3 = vld [vmem:[%s3359_s3 + $0x300] sm:$0xff] }
 0x26a   : > { %1506 = vmatpush1.msra.mxu0 %v2204_v5  ;;  %v1235_v5 = vld [vmem:[%s3359_s3 + $0x38] sm:$0xff] }
 0x26b   : > { %1507 = vmatprep.subr.mxu0 %v2203_v6  ;;  %v2249_v6 = vld [vmem:[%s3359_s3 + $0x2f8] sm:$0xff] }
 0x26c   : > { %1508 = vmatpush1.msra.mxu0 %v2202_v7  ;;  %v1234_v7 = vld [vmem:[%s3359_s3 + $0x30] sm:$0xff] }
 0x26d   : > { %1509 = vmatprep.subr.mxu0 %v2201_v9  ;;  %v2248_v9 = vld [vmem:[%s3359_s3 + $0x2f0] sm:$0xff] }
 0x26e   : > { %1510 = vmatpush1.msra.mxu0 %v2200_v13  ;;  %v1233_v13 = vld [vmem:[%s3359_s3 + $0x28] sm:$0xff] }
 0x26f   : > { %1511 = vmatprep.subr.mxu0 %v2199_v14  ;;  %v2247_v14 = vld [vmem:[%s3359_s3 + $0x2e8] sm:$0xff] }
 0x270   : > { %1512 = vmatpush1.msra.mxu0 %v2198_v15  ;;  %v1232_v15 = vld [vmem:[%s3359_s3 + $0x20] sm:$0xff] }
 0x271   : > { %1513 = vmatprep.subr.mxu0 %v2197_v16  ;;  %v2246_v16 = vld [vmem:[%s3359_s3 + $0x2e0] sm:$0xff] }
 0x272   : > { %1514 = vmatpush1.msra.mxu0 %v2196_v8  ;;  %v2245_v8 = vld [vmem:[%s3359_s3 + $0x2d8] sm:$0xff] }
 0x273   : > { %1515 = vmatprep.subr.mxu0 %v2195_v11  ;;  %v2244_v11 = vld [vmem:[%s3359_s3 + $0x2d0] sm:$0xff] }
 0x274   : > { %1516 = vmatpush1.msra.mxu0 %v2194_v12  ;;  %v2243_v12 = vld [vmem:[%s3359_s3 + $0x2c8] sm:$0xff] }
 0x275   : > { %1517 = vmatprep.subr.mxu0 %v2193_v22 }
 0x276   : > { %1518 = vmatpush1.msra.mxu0 %v2192_v24  ;;  %v2237_v24 = vld [vmem:[%s3359_s3 + $0x2b8] sm:$0xf] }
 0x277   : > { %1519 = vmatprep.subr.mxu0 %v2191_v28  ;;  %v2236_v28 = vld [vmem:[%s3359_s3 + $0x2b0] sm:$0xf] }
 0x278   : > { %1520 = vmatpush1.msra.mxu0 %v2190_v31 }
 0x279   : > { %2264 = vmatprep.subr.msk.mxu0 %vm812_vm4, %v2263_v34  ;;  %v2233_v34 = vld [vmem:[%s3359_s3 + $0x298] sm:$0xff] }
 0x323   : > { %v3005_v10 = vpop.f32.mrf.mxu0 }
 0x324   : > { %v1275_v29 = vrot.slane %v3005_v10, 1  ;;  %v1476_v26 = vrot.slane %v3005_v10, 2  ;;  %v1710_v25 = vrot.slane %v3005_v10, 4 }
 0x325   : > { %v1220_v21 = vpop.f32.mrf.mxu0 }
 0x326   : > { %v2232_v21 = vld [vmem:[%s3359_s3 + $0x290] sm:$0xff] }
 0x327   : > { %v3007_v27 = vpop.f32.mrf.mxu0 }
 0x328   : > { %v1276_v35 = vrot.slane %v3007_v27, 1  ;;  %v1477_v36 = vrot.slane %v3007_v27, 2  ;;  %v1711_v22 = vrot.slane %v3007_v27, 4 }
 0x329   : > { %v1225_v32 = vpop.f32.mrf.mxu0 }
 0x32a   : > { %v1277_v39 = vsel %vm356_vm0, %v1275_v29, %v1276_v35  ;;  %v1478_v40 = vsel %vm568_vm3, %v1476_v26, %v1477_v36  ;;  %v1712_v31 = vsel %vm812_vm4, %v1710_v25, %v1711_v22  ;;  %v2231_v29 = vld [vmem:[%s3359_s3 + $0x288] sm:$0xff]  ;;  %v2230_v26 = vld [vmem:[%s3359_s3 + $0x280] sm:$0xff] }
 0x32b   : > { %2184 = vmatmul.mubr.msk.f32.vlgmr.msra.gmra.mxu1 %vm1278_vm10, %v1277_v39  ;;  %2214 = vmatmul.mubr.msk.f32.vlgmr.msra.gmra.mxu0 %vm1278_vm10, %v1478_v40  ;;  %v2227_v32 = vld [vmem:[%s3359_s3 + $0x268] sm:$0xff]  ;;  %v2224_v39 = vld [vmem:[%s3359_s3 + $0x250] sm:$0xff] }
 0x32c   : > { %2187 = vmatpush1.msk.msra.mxu1 %vm812_vm4, %v1248_v37  ;;  %2265 = vmatpush1.msk.msra.mxu0 %vm812_vm4, %v2262_v38  ;;  %v2226_v37 = vld [vmem:[%s3359_s3 + $0x260] sm:$0xff]  ;;  %v2225_v38 = vld [vmem:[%s3359_s3 + $0x258] sm:$0xff]  ;;  %v2223_v40 = vld [vmem:[%s3359_s3 + $0x248] sm:$0xff] }
 0x32d   : > { %1388 = vmatprep.subr.mxu1 %v1247_v42  ;;  %1735 = vmatprep.subr.mxu0 %v2261_v43  ;;  %v2222_v42 = vld [vmem:[%s3359_s3 + $0x240] sm:$0xff]  ;;  %v2221_v43 = vld [vmem:[%s3359_s3 + $0x238] sm:$0xff] }
 0x32e   : > { %1389 = vmatpush1.msra.mxu1 %v1246_v44  ;;  %1736 = vmatpush1.msra.mxu0 %v2260_v45  ;;  %v2220_v44 = vld [vmem:[%s3359_s3 + $0x230] sm:$0xff]  ;;  %v2219_v45 = vld [vmem:[%s3359_s3 + $0x228] sm:$0xff] }
 0x32f   : > { %1359 = vmatprep.mubr.f32.mxu1 %v2396_v4  ;;  %1390 = vmatprep.subr.mxu1 %v1245_v46  ;;  %v2218_v46 = vld [vmem:[%s3359_s3 + $0x220] sm:$0xff] }
 0x330   : > { %1559 = vmatprep.mubr.f32.mxu0 %v2396_v4  ;;  %1737 = vmatprep.subr.mxu0 %v2259_v48  ;;  %v1594_v48 = vrot.slane %v3007_v27, 3 }
 0x331   : > { %2185 = vmatmul.mubr.msk.f32.gmra.mxu1 %vm1278_vm10, %v1276_v35  ;;  %2215 = vmatmul.mubr.msk.f32.gmra.mxu0 %vm1278_vm10, %v1477_v36  ;;  %v2229_v35 = vld [vmem:[%s3359_s3 + $0x278] sm:$0xff]  ;;  %v2228_v36 = vld [vmem:[%s3359_s3 + $0x270] sm:$0xff] }
 0x332   : > { %1391 = vmatpush1.msra.mxu1 %v1244_v49  ;;  %1738 = vmatpush1.msra.mxu0 %v2258_v50  ;;  %v2217_v49 = vld [vmem:[%s3359_s3 + $0x218] sm:$0xff]  ;;  %v2216_v50 = vld [vmem:[%s3359_s3 + $0x210] sm:$0xff] }
 0x333   : > { %1392 = vmatprep.subr.mxu1 %v1243_v51  ;;  %1739 = vmatprep.subr.mxu0 %v2257_v52  ;;  %v1593_v51 = vrot.slane %v3005_v10, 3 }
 0x334   : > { %1393 = vmatpush1.msra.mxu1 %v1242_v53  ;;  %1740 = vmatpush1.msra.mxu0 %v2256_v54  ;;  %v1873_v53 = vld [vmem:[%s3363_s7 + $0x68] sm:$0xff]  ;;  %v1872_v54 = vld [vmem:[%s3363_s7 + $0x60] sm:$0xff] }
 0x335   : > { %1394 = vmatprep.subr.mxu1 %v1241_v55  ;;  %1741 = vmatprep.subr.mxu0 %v2255_v56  ;;  %v1595_v52 = vsel %vm690_vm2, %v1593_v51, %v1594_v48  ;;  %v1871_v55 = vld [vmem:[%s3363_s7 + $0x58] sm:$0xff]  ;;  %v1870_v56 = vld [vmem:[%s3363_s7 + $0x50] sm:$0xff] }
 0x336   : > { %1395 = vmatpush1.msra.mxu1 %v1240_v57  ;;  %1742 = vmatpush1.msra.mxu0 %v2254_v58  ;;  %v1869_v57 = vld [vmem:[%s3363_s7 + $0x48] sm:$0xff]  ;;  %v1868_v58 = vld [vmem:[%s3363_s7 + $0x40] sm:$0xff] }
 0x337   : > { %1396 = vmatprep.subr.mxu1 %v1239_v60  ;;  %1743 = vmatprep.subr.mxu0 %v2253_v61  ;;  %v1867_v60 = vld [vmem:[%s3363_s7 + $0x38] sm:$0xff]  ;;  %v1866_v61 = vld [vmem:[%s3363_s7 + $0x30] sm:$0xff] }
 0x338   : > { %1397 = vmatpush1.msra.mxu1 %v1238_v62  ;;  %1744 = vmatpush1.msra.mxu0 %v2252_v63 }
 0x339   : > { %1398 = vmatprep.subr.mxu1 %v1237_v0  ;;  %1745 = vmatprep.subr.mxu0 %v2251_v1 }
 0x33a   : > { %1399 = vmatpush1.msra.mxu1 %v1236_v2  ;;  %1746 = vmatpush1.msra.mxu0 %v2250_v3 }
 0x33b   : > { %1400 = vmatprep.subr.mxu1 %v1235_v5  ;;  %1747 = vmatprep.subr.mxu0 %v2249_v6 }
 0x33c   : > { %1401 = vmatpush1.msra.mxu1 %v1234_v7  ;;  %1748 = vmatpush1.msra.mxu0 %v2248_v9 }
 0x33d   : > { %1402 = vmatprep.subr.mxu1 %v1233_v13  ;;  %1749 = vmatprep.subr.mxu0 %v2247_v14 }
 0x33e   : > { %1403 = vmatpush1.msra.mxu1 %v1232_v15  ;;  %1750 = vmatpush1.msra.mxu0 %v2246_v16  ;;  %v1865_v16 = vld [vmem:[%s3363_s7 + $0x28] sm:$0xff] }
 0x33f   : > { %1404 = vmatprep.subr.mxu1 %v1231_v17  ;;  %1751 = vmatprep.subr.mxu0 %v2245_v8 }
 0x340   : > { %1405 = vmatpush1.msra.mxu1 %v1230_v18  ;;  %1752 = vmatpush1.msra.mxu0 %v2244_v11  ;;  %v1864_v18 = vld [vmem:[%s3363_s7 + $0x20] sm:$0xff] }
 0x341   : > { %1406 = vmatprep.subr.mxu1 %v1229_v19  ;;  %1753 = vmatprep.subr.mxu0 %v2243_v12 }
 0x342   : > { %1407 = vmatpush1.msra.mxu1 %v1228_v20  ;;  %1440 = vmatprep.mubr.f32.mxu1 %v2396_v4  ;;  %v1863_v20 = vld [vmem:[%s3363_s7 + $0x18] sm:$0xff] }
 0x343   : > { %1754 = vmatpush1.msra.mxu0 %v2242_v23  ;;  %1787 = vmatprep.mubr.f32.mxu0 %v2396_v4  ;;  %v1227_v23 = vld [vmem:[%s3360_s4] sm:$0x3] }
 0x344   : > { %2188 = vmatmul.mubr.msk.f32.vlgmr.msra.gmra.mxu1 %vm1278_vm10, %v3005_v10  ;;  %2238 = vmatprep.subr.msk.mxu1 %vm812_vm4, %v2237_v24  ;;  %v1874_v10 = vld [vmem:[%s3363_s7 + $0x70] sm:$0xff] }
 0x345   : > { %2266 = vmatmul.mubr.msk.f32.vlgmr.msra.gmra.mxu0 %vm1278_vm10, %v1712_v31  ;;  %2239 = vmatpush1.msk.msra.mxu1 %vm812_vm4, %v2236_v28  ;;  %v1862_v28 = vld [vmem:[%s3363_s7 + $0x10] sm:$0xff] }
 0x346   : > { %1618 = vmatprep.subr.mxu1 %v2235_v30  ;;  %1446 = vmatprep.mubr.f32.mxu1 %v2396_v4 }
 0x347   : > { %1619 = vmatpush1.msra.mxu1 %v2234_v33  ;;  %1793 = vmatprep.mubr.f32.mxu0 %v2396_v4 }
 0x348   : > { %2189 = vmatmul.mubr.msk.f32.gmra.mxu1 %vm1278_vm10, %v3007_v27  ;;  %1620 = vmatprep.subr.mxu1 %v2233_v34  ;;  %v1875_v27 = vld [vmem:[%s3363_s7 + $0x78] sm:$0xff] }
 0x349   : > { %2267 = vmatmul.mubr.msk.f32.gmra.mxu0 %vm1278_vm10, %v1711_v22  ;;  %1621 = vmatpush1.msra.mxu1 %v2232_v21  ;;  %v1812_v21 = vrot.slane %v1227_v23, %v932_v59 }
 0x34a   : > { %1622 = vmatprep.subr.mxu1 %v2231_v29  ;;  %1670 = vmatprep.mubr.f32.mxu1 %v2396_v4  ;;  %v1808_v29 = vrot.slane %v1227_v23, %v928_v47  ;;  %v1860_v47 = vld [vmem:[%s3363_s7] sm:$0xff] }
 0x34b   : > { %1623 = vmatpush1.msra.mxu1 %v2230_v26 }
 0x34c   : > { %1624 = vmatprep.subr.mxu1 %v2229_v35 }
 0x34d   : > { %1625 = vmatpush1.msra.mxu1 %v2228_v36 }
 0x34e   : > { %1626 = vmatprep.subr.mxu1 %v2227_v32 }
 0x34f   : > { %1627 = vmatpush1.msra.mxu1 %v2226_v37 }
 0x350   : > { %1628 = vmatprep.subr.mxu1 %v2225_v38  ;;  %v1861_v38 = vld [vmem:[%s3363_s7 + $0x8] sm:$0xff] }
 0x351   : > { %1629 = vmatpush1.msra.mxu1 %v2224_v39 }
 0x352   : > { %1630 = vmatprep.subr.mxu1 %v2223_v40 }
 0x353   : > { %1631 = vmatpush1.msra.mxu1 %v2222_v42 }
 0x354   : > { %1632 = vmatprep.subr.mxu1 %v2221_v43 }
 0x355   : > { %1633 = vmatpush1.msra.mxu1 %v2220_v44 }
 0x356   : > { %1634 = vmatprep.subr.mxu1 %v2219_v45 }
 0x357   : > { %1635 = vmatpush1.msra.mxu1 %v2218_v46  ;;  %v1877_v46 = vld [vmem:[%s3363_s7 + $0x88] sm:$0xff] }
 0x358   : > { %1636 = vmatprep.subr.mxu1 %v2217_v49  ;;  %v1876_v49 = vld [vmem:[%s3363_s7 + $0x80] sm:$0xff] }
 0x359   : > { %1637 = vmatpush1.msra.mxu1 %v2216_v50 }
 0x35a   : > { %2240 = vmatmul.mubr.msk.f32.vlgmr.msra.gmra.mxu1 %vm1278_vm10, %v1595_v52  ;;  %1885 = vmatprep.subr.mxu1 %v2396_v4 }
 0x35b   : > { %1676 = vmatprep.mubr.f32.mxu1 %v2396_v4  ;;  %1886 = vmatpush1.msra.mxu1 %v1875_v27 }
 0x35c   : > { %1887 = vmatprep.subr.mxu1 %v2396_v4 }
 0x35d   : > { %1888 = vmatpush1.msra.mxu1 %v1874_v10 }
 0x35e   : > { %2241 = vmatmul.mubr.msk.f32.gmra.mxu1 %vm1278_vm10, %v1594_v48  ;;  %1889 = vmatprep.subr.mxu1 %v2396_v4 }
 0x35f   : > { %1890 = vmatpush1.msra.mxu1 %v1873_v53 }
 0x360   : > { %1891 = vmatprep.subr.mxu1 %v2396_v4 }
 0x361   : > { %1892 = vmatpush1.msra.mxu1 %v1872_v54 }
 0x362   : > { %1893 = vmatprep.subr.mxu1 %v2396_v4 }
 0x363   : > { %1894 = vmatpush1.msra.mxu1 %v1871_v55 }
 0x364   : > { %1895 = vmatprep.subr.mxu1 %v2396_v4 }
 0x365   : > { %1896 = vmatpush1.msra.mxu1 %v1870_v56 }
 0x366   : > { %1897 = vmatprep.subr.mxu1 %v2396_v4 }
 0x367   : > { %1898 = vmatpush1.msra.mxu1 %v1869_v57 }
 0x368   : > { %1899 = vmatprep.subr.mxu1 %v2396_v4 }
 0x369   : > { %1900 = vmatpush1.msra.mxu1 %v1868_v58 }
 0x36a   : > { %1901 = vmatprep.subr.mxu1 %v2396_v4 }
 0x36b   : > { %1902 = vmatpush1.msra.mxu1 %v1867_v60 }
 0x36c   : > { %1903 = vmatprep.subr.mxu1 %v2396_v4 }
 0x36d   : > { %1904 = vmatpush1.msra.mxu1 %v1866_v61 }
 0x36e   : > { %1905 = vmatprep.subr.mxu1 %v2396_v4 }
 0x36f   : > { %1906 = vmatpush1.msra.mxu1 %v1865_v16 }
 0x370   : > { %1907 = vmatprep.subr.mxu1 %v2396_v4 }
 0x371   : > { %1908 = vmatpush1.msra.mxu1 %v1864_v18 }
 0x372   : > { %1909 = vmatprep.subr.mxu1 %v2396_v4 }
 0x373   : > { %1910 = vmatpush1.msra.mxu1 %v1863_v20 }
 0x374   : > { %1911 = vmatprep.subr.mxu1 %v2396_v4 }
 0x375   : > { %1912 = vmatpush1.msra.mxu1 %v1862_v28 }
 0x376   : > { %1913 = vmatprep.subr.mxu1 %v2396_v4 }
 0x377   : > { %1914 = vmatpush1.msra.mxu1 %v1861_v38 }
 0x378   : > { %1915 = vmatprep.subr.mxu1 %v2396_v4 }
 0x379   : > { %1916 = vmatpush1.msra.mxu1 %v1860_v47 }
 0x37a   : > { %1945 = vmatprep.subr.mxu1 %v2396_v4 }
 0x37b   : > { %1946 = vmatpush2.msra.mxu1 %v1877_v46 }
 0x37c   : > { %1947 = vmatprep.subr.mxu1 %v2396_v4 }
 0x37d   : > { %1948 = vmatpush2.msra.mxu1 %v1876_v49 }
 0x3eb   : > { %v1355_v62 = vpop.f32.mrf.mxu1  ;;  %v1555_v1 = vpop.f32.mrf.mxu0 }
 0x3ed   : > { %v1357_v63 = vpop.f32.mrf.mxu1  ;;  %v1557_v5 = vpop.f32.mrf.mxu0 }
 0x3f1   : > { %v1361_v0 = vpop.f32.mrf.mxu1  ;;  %v1561_v7 = vpop.f32.mrf.mxu0 }
 0x3f3   : > { %v1363_v2 = vpop.f32.mrf.mxu1  ;;  %v1563_v14 = vpop.f32.mrf.mxu0 }
 0x404   : > { %v1442_v3 = vpop.f32.mrf.mxu1 }
 0x405   : > { %v1443_v13 = vadd.f32 %v1442_v3, %v1355_v62  ;;  %v1789_v17 = vpop.f32.mrf.mxu0 }
 0x406   : > { %v1444_v6 = vpop.f32.mrf.mxu1 }
 0x407   : > { %v1445_v15 = vadd.f32 %v1444_v6, %v1357_v63  ;;  %v1566_v19 = vadd.f32 %v1555_v1, %v1443_v13  ;;  %v1791_v30 = vpop.f32.mrf.mxu0  ;;  %v2399_v13 = vmov 1966171168  }
 0x408   : > { %v1448_v9 = vpop.f32.mrf.mxu1 }
 0x409   : > { %v1449_v11 = vadd.f32 %v1448_v9, %v1361_v0  ;;  %v1567_v25 = vadd.f32 %v1557_v5, %v1445_v15  ;;  %v1795_v39 = vpop.f32.mrf.mxu0 }
 0x40a   : > { %v1450_v8 = vpop.f32.mrf.mxu1 }
 0x40b   : > { %v1451_v22 = vadd.f32 %v1450_v8, %v1363_v2  ;;  %v1568_v34 = vadd.f32 %v1561_v7, %v1449_v11  ;;  %v1797_v48 = vpop.f32.mrf.mxu0 }
 0x40d   : > { %v1569_v37 = vadd.f32 %v1563_v14, %v1451_v22  ;;  %v1964_v14 = vunpack.c.l.s4 %v2399_v13 }
 0x40f   : > { %v1965_v15 = vunpack.c.0.s8 %v1964_v14 }
 0x411   : > { %v1968_v16 = vsub.s32 %v1965_v15, %v2714_v41  ;;  %v1960_v41 = vld [vmem:[%s3364_s8] sm:$0x1] }
 0x41a   : > { %v1672_v12 = vpop.f32.mrf.mxu1 }
 0x41b   : > { %v1683_v24 = vadd.f32 %v1672_v12, %v1566_v19 }
 0x41c   : > { %v1674_v31 = vpop.f32.mrf.mxu1 }
 0x41d   : > { %v1684_v33 = vadd.f32 %v1674_v31, %v1567_v25  ;;  %v1800_v35 = vadd.f32 %v1789_v17, %v1683_v24 }
 0x41e   : > { %v1678_v26 = vpop.f32.mrf.mxu1 }
 0x41f   : > { %v1801_v36 = vadd.f32 %v1791_v30, %v1684_v33  ;;  %v1685_v32 = vadd.f32 %v1678_v26, %v1568_v34  ;;  %v1815_v44 = vadd.f32 %v1808_v29, %v1800_v35 }
 0x420   : > { %v1680_v40 = vpop.f32.mrf.mxu1 }
 0x421   : > { %v1802_v59 = vadd.f32 %v1795_v39, %v1685_v32  ;;  %v1686_v42 = vadd.f32 %v1680_v40, %v1569_v37  ;;  %v1816_v43 = vadd.f32 %v1812_v21, %v1801_v36 }
 0x423   : > { %v1817_v45 = vadd.f32 %v1808_v29, %v1802_v59  ;;  %1825 = vrot.lane.b32.xlu1 %v1816_v43, %s2398_s17  ;;  %v1803_v50 = vadd.f32 %v1797_v48, %v1686_v42 }
 0x425   : > { %v2329_v51 = vpack.i.bf16 %v1817_v45, %v1815_v44  ;;  %v1818_v52 = vadd.f32 %v1812_v21, %v1803_v50 }
 0x427   : > { %2330 = vrot.lane.b32.xlu0 %v2329_v51, %s2398_s17 }
 0x42b   : > { %1829 = vrot.lane.b32.xlu0 %v1818_v52, %s2398_s17  ;;  %s324_s17 = scalar_lea.vmem [#allocation2], %s323_s18 }
 0x42c   : > { %s2040_s22 = sshll.u32 %s324_s17, 4  ;;  %s2041_s22 = int_to_ptr.vmem [resolvable:$true] %s2040_s22 }
 0x495   : > { %v1826_v27 = vpop.permute.xlu1 %1825 }
 0x496   : > { %v1839_v54 = vmax.f32 %v1816_v43, %v1826_v27 }
 0x498   : > { %v1849_v63 = vrot.slane %v1839_v54, 1 }
 0x499   : > { %v2331_v10 = vpop.permute.xlu0 %2330 }
 0x49a   : > { %v2332_v53 = vunpack.i.l.bf16 %v2331_v10  ;;  %v2333_v55 = vunpack.i.h.bf16 %v2331_v10 }
 0x49c   : > { %v1832_v56 = vsel %vm1831_vm11, %v2332_v53, %v1826_v27 }
 0x49d   : > { %v1838_v57 = vmax.f32 %v1815_v44, %v1832_v56  ;;  %v1830_v58 = vpop.permute.xlu0 %1829 }
 0x49e   : > { %v1833_v60 = vsel %vm1831_vm11, %v2333_v55, %v1830_v58  ;;  %v1841_v61 = vmax.f32 %v1818_v52, %v1830_v58 }
 0x49f   : > { %v1840_v62 = vmax.f32 %v1817_v45, %v1833_v60  ;;  %v1846_v1 = vrot.slane %v1838_v57, 1 }
 0x4a0   : > { %v1850_v0 = vrot.slane %v1841_v61, 1 }
 0x4a1   : > { %v1847_v4 = vrot.slane %v1840_v62, 1 }
 0x4a2   : > { %v1851_v2 = vsel %vm356_vm0, %v1849_v63, %v1850_v0  ;;  %v1859_v7 = vmax.f32 %v1841_v61, %v1850_v0 }
 0x4a3   : > { %v1848_v3 = vsel %vm356_vm0, %v1846_v1, %v1847_v4  ;;  %v1857_v5 = vmax.f32 %v1839_v54, %v1851_v2  ;;  %v1858_v9 = vmax.f32 %v1840_v62, %v1847_v4 }
 0x4a4   : > { %v1856_v6 = vmax.f32 %v1838_v57, %v1848_v3 }
 0x4a5   : > { %2268 = vmatprep.mubr.msk.f32.mxu1 %vm1878_vm12, %v1857_v5 }
 0x4a6   : > { %1950 = vmatmul.mubr.f32.vlgmr.msra.gmra.mxu1 %v1856_v6 }
 0x4a7   : > { %2269 = vmatprep.mubr.msk.f32.mxu1 %vm1878_vm12, %v1859_v7 }
 0x4aa   : > { %1955 = vmatmul.mubr.f32.gmra.mxu1 %v1858_v9 }
 0x566   : > { %v1951_v17 = vpop.f32.mrf.mxu1 }
 0x567   : > { %v1969_v8 = vrot.slane %v1951_v17, %v1968_v16  ;;  %v1982_v18 = vcombine.high %v1951_v17, %v1951_v17  ;;  %v1961_v31 = vadd.f32 %v1960_v41, %v1951_v17 }
 0x568   : > { %v1953_v11 = vpop.f32.mrf.mxu1 }
 0x569   : > { %v1989_v19 = vrot.slane %v1982_v18, %v1968_v16  ;;  %v1976_v12 = vrot.slane %v1969_v8, %v1968_v16 }
 0x56a   : > { %v1956_v20 = vpop.f32.mrf.mxu1 }
 0x56b   : > { %v2013_v22 = vrot.slane %v1956_v20, %v1968_v16  ;;  %v1996_v23 = vrot.slane %v1989_v19, %v1968_v16  ;;  %v1977_v24 = vcombine.high %v1976_v12, %v1976_v12 }
 0x56c   : > { %v1958_v25 = vpop.f32.mrf.mxu1 }
 0x56d   : > { %1997 = vrot.lane.b32.xlu0 %v1996_v23, %s2400_s26  ;;  %1978 = vrot.lane.b32.xlu1 %v1977_v24, %s2401_s27  ;;  %v2020_v28 = vrot.slane %v2013_v22, %v1968_v16  ;;  %v2001_v30 = vcombine.high %v1996_v23, %v1996_v23  ;;  %s2028_s26 = scalar_lea.sflag [#allocation3], %s323_s18  ;;  %s2334_s27 = scalar_lea.vmem %s2041_s22, 16 }
 0x56e   : > { %p2335_p11 = scmp.ne.s32.totalorder %s2041_s22, %s2334_s27 }
 0x570   : > { %p2336_p12 = pnand %p2335_p11, %p2493_p5 }
 0x571   : > { %2002 = vrot.lane.b32.xlu1 %v2001_v30, %s2402_s28  ;;  %2021 = vrot.lane.b32.xlu0 %v2020_v28, %s2403_s29  ;;  %s2404_s28 = smov [#allocation2]  }
 0x572   : > { %p2337_p13 = pneg %p2336_p12  ;;  %s2338_s13 = sshll.u32 %s2404_s28, 4  ;;  %s2339_s13 = int_to_ptr.vmem [resolvable:$false] %s2338_s13 }
 0x573   : > { %s2340_s29 = scalar_lea.vmem %s2339_s13, 32  ;;  %p2341_p0 = scmp.lt.s32.totalorder %s2041_s22, %s2339_s13 }
 0x574   : > { %p2342_p1 = scmp.lt.s32.totalorder %s2340_s29, %s2334_s27 }
 0x576   : > { %p2343_p2 = por %p2342_p1, %p2341_p0 }
 0x578   : > { %p2344_p3 = pnand %p2343_p2, %p2337_p13 }
 0x5df   : > { %v1998_v33 = vpop.permute.xlu0 %1997  ;;  %v1979_v34 = vpop.permute.xlu1 %1978 }
 0x5e0   : > { %v1981_v21 = vadd.f32 %v1979_v34, %v1961_v31 }
 0x5e2   : > { %v2000_v29 = vadd.f32 %v1998_v33, %v1981_v21 }
 0x5e3   : > { %v2003_v26 = vpop.permute.xlu1 %2002  ;;  %v2022_v36 = vpop.permute.xlu0 %2021 }
 0x5e4   : > { %v2005_v35 = vadd.f32 %v2003_v26, %v2000_v29 }
 0x5e6   : > { %v2024_v32 = vadd.f32 %v2022_v36, %v2005_v35 }
 0x5e8   : > { %2026 = vst.msk [vmem:[%s324_s17] sm:$0x1] %vm2025_vm13, %v2024_v32 }
 0x5e9   : > { %2347 = shalt.err (!%p2344_p3)
}
 0x5ea   : > { %s2348_s21 = scalar_lea.hbm %s2038_s25, 16  ;;  %s2352_s16 = scalar_lea.hbm %s3365_s9, 32 }
 0x5eb   : > { %p2349_p4 = scmp.ne.s32.totalorder %s2038_s25, %s2348_s21  ;;  %p2353_p9 = scmp.lt.s32.totalorder %s2038_s25, %s3365_s9 }
 0x5ec   : > { %p2354_p10 = scmp.lt.s32.totalorder %s2352_s16, %s2348_s21 }
 0x5ed   : > { %p2350_p7 = pnand %p2349_p4, %p2493_p5 }
 0x5ee   : > { %p2355_p11 = por %p2354_p10, %p2353_p9 }
 0x5ef   : > { %p2351_p8 = pneg %p2350_p7 }
 0x5f1   : > { %p2356_p12 = pnand %p2355_p11, %p2351_p8 }
 0x5f3   : > { %2359 = shalt.err (!%p2356_p12)
}
 0x5f4   : > { %2282 = dma.vmem_to_hbm [thread:$0]  (%p2493_p5), %s2041_s22, 16, %s2038_s25, %s2028_s26  }
 0x5f5 PF: > { %p2288_p13 = scmp.ge.s32.totalorder %s2394_s12, 2  ;;  %s2052_s24 = sand.u32 1, %s2382_s30  }
 0x5f6   : > { %s2053_s27 = scalar_lea.sflag [#allocation3], %s2052_s24 }
 0x5f7   : > { %p2285_p0 = pnand %p2288_p13, %p2497_p6 }
 0x5f9   : > { %p2286_p1 = pneg %p2285_p0 }
 0x5fb   : > { %2377 = dma.done.wait (%p2286_p1), %s2053_s27, 16  }
 0x5fc   : > { %2379 = vsyncadd (%p2286_p1), %s2053_s27, 4294967280  ;;  %s3369_s28 = sld [smem:[#allocation5_spill]]  ;;  %p19_p2 = scmp.ge.s32.totalorder %s2480_s15, 4  }
 0x5fd   : > { %s3370_s30 = smov %s2386_s10  ;;  %s3371_s10 = smov %s2390_s11 }
 0x5fe   : > { %s3373_s12 = smov %s2480_s15  ;;  %21 = sbr.rel (!%p19_p2) target bundleno = 3 (0x3), region = 99 }
 0x602   : > { %s3372_s11 = smov %s3369_s28 }
 0x603   :  { %2057 = vsyncpa [#allocation3], 1 }
 0x604   :  { %2059 = vsyncpa [#allocation3 + $0x1], 1 }

</bundles_post_ra>
